<compile_context>
chip_gen: v7x
topology: tpu7x:2x2x1
jax: 0.10.0
libtpu: 0.0.40
codegen_flags: <defaults>
</compile_context>

<pallas_src>
import functools

import jax
import jax.numpy as jnp
from jax.experimental import pallas as pl
from jax.experimental.pallas import tpu as pltpu


def _multiscale_loss_kernel(x_ref, pred_ref, p_ref, w_ref, res_ref, *, n, c):
    """Fused all-scale EPE loss.

    x_ref:    (C*N, H*W)   f32, rows ordered channel-major (c*N + n)
    pred_ref: (C*N, Pcols) f32, packed + zero-padded predictions (same order)
    p_ref:    (H*W, Pcols) f32, pooling operator (div_flow & 1/k^2 folded in)
    w_ref:    (1,   Pcols) f32, per-column weight = w_i / (N*h_i*w_i), 0 on pad
    res_ref:  (1,)         f32 in SMEM, the scalar loss
    """
    # One lane-dense MXU matmul does the pooling for every (n, c) and scale.
    pooled = jnp.dot(
        x_ref[...], p_ref[...],
        preferred_element_type=jnp.float32,
        precision=jax.lax.Precision.HIGHEST,
    )                                                   # (C*N, Pcols)

    d = pooled - pred_ref[...]                          # padded cols -> 0
    sq = d * d                                          # (C*N, Pcols)

    # Channel sum: rows are channel-major, so channels are contiguous blocks.
    chan = sq[0:n, :]
    for ci in range(1, c):
        chan = chan + sq[ci * n:(ci + 1) * n, :]        # (N, Pcols)

    epe = jnp.sqrt(chan)                                # batched EUP sqrt
    res_ref[0] = jnp.sum(epe * w_ref[...])              # single reduce


def multiscale_loss(output_list, target, *, div_flow=0.05, start_scale=4,
                    num_scales=3, l_weight=0.32):
    """JAX/Pallas equivalent of MultiscaleLoss.forward. Returns [scalar]."""
    assert len(output_list) == num_scales
    N, C, H, W = target.shape
    ks = [start_scale * (2 ** i) for i in range(num_scales)]
    # PyTorch AvgPool2d floors non-divisible sizes; this kernel assumes exact
    # divisibility (true for FlowNet-style inputs).
    assert H % ks[-1] == 0 and W % ks[-1] == 0, (H, W, ks[-1])

    seg_sizes = [(H // k) * (W // k) for k in ks]
    total_cols = sum(seg_sizes)
    pcols = max(128, -(-total_cols // 128) * 128)       # pad to multiple of 128
    pad = pcols - total_cols

    # ---- host-side packing (trace-time glue) -------------------------------
    p_blocks, w_blocks, pred_blocks = [], [], []
    for i, (k, pred) in enumerate(zip(ks, output_list)):
        h, w = H // k, W // k
        assert pred.shape == (N, C, h, w), (pred.shape, (N, C, h, w))
        # Pooling operator for this scale, div_flow and 1/k^2 folded in:
        #   P_k[y*W + x, ph*w + pw] = div_flow/k^2 if (y//k, x//k) == (ph, pw)
        my = (jnp.arange(H) // k)[:, None] == jnp.arange(h)[None, :]   # (H, h)
        mx = (jnp.arange(W) // k)[:, None] == jnp.arange(w)[None, :]   # (W, w)
        pk = (my[:, None, :, None] & mx[None, :, None, :]).astype(jnp.float32)
        p_blocks.append(pk.reshape(H * W, h * w) * (div_flow / (k * k)))
        # Per-column weight = loss_weight_i / (N * h * w)  (folds the mean).
        w_blocks.append(
            jnp.full((h * w,), (l_weight / (2 ** i)) / (N * h * w), jnp.float32))
        # Predictions packed channel-major, flattened spatially, lane-dense.
        pred_blocks.append(
            jnp.transpose(pred, (1, 0, 2, 3)).reshape(C * N, h * w)
            .astype(jnp.float32))

    P = jnp.pad(jnp.concatenate(p_blocks, axis=1), ((0, 0), (0, pad)))
    wvec = jnp.pad(jnp.concatenate(w_blocks)[None, :], ((0, 0), (0, pad)))
    preds = jnp.pad(jnp.concatenate(pred_blocks, axis=1), ((0, 0), (0, pad)))
    X = jnp.transpose(target, (1, 0, 2, 3)).reshape(C * N, H * W) \
           .astype(jnp.float32)

    # ---- single fused kernel call ------------------------------------------
    out = pl.pallas_call(
        functools.partial(_multiscale_loss_kernel, n=N, c=C),
        out_shape=jax.ShapeDtypeStruct((1,), jnp.float32),
        in_specs=[pl.BlockSpec(memory_space=pltpu.MemorySpace.VMEM)] * 4,
        out_specs=pl.BlockSpec(memory_space=pltpu.MemorySpace.SMEM),
    )(X, preds, P, wvec)
    return [out[0]]


def _reference_loss(output_list, target, *, div_flow=0.05, start_scale=4,
                    l_weight=0.32):
    """Pure-JAX reference for correctness checking."""
    t = div_flow * target
    N, C, H, W = t.shape
    total = 0.0
    for i, pred in enumerate(output_list):
        k = start_scale * (2 ** i)
        h, w = H // k, W // k
        pooled = t.reshape(N, C, h, k, w, k).mean(axis=(3, 5))
        epe = jnp.sqrt(jnp.sum((pooled - pred) ** 2, axis=1)).mean()
        total = total + (l_weight / 2 ** i) * epe
    return total


if __name__ == "__main__":
    key = jax.random.PRNGKey(0)
    N, C, H, W = 2, 2, 32, 32          # flow has 2 channels (u, v)
    k_t, k0, k1, k2 = jax.random.split(key, 4)

    target = jax.random.normal(k_t, (N, C, H, W), dtype=jnp.float32)
    outputs = [
        jax.random.normal(k0, (N, C, H // 4, W // 4), dtype=jnp.float32),
        jax.random.normal(k1, (N, C, H // 8, W // 8), dtype=jnp.float32),
        jax.random.normal(k2, (N, C, H // 16, W // 16), dtype=jnp.float32),
    ]

    loss = multiscale_loss(outputs, target)
    loss_val = jax.block_until_ready(loss[0])

    ref = _reference_loss(outputs, target)
    assert jnp.allclose(loss_val, ref, rtol=1e-5, atol=1e-5), (loss_val, ref)

    print("KERNEL_OK")
</pallas_src>

<mosaic_0001>
module attributes {stable_mosaic.version = 11 : i64} {
  func.func @_multiscale_loss_kernel(%arg0: memref<4x1024xf32, #tpu.memory_space<vmem>>, %arg1: memref<4x128xf32, #tpu.memory_space<vmem>>, %arg2: memref<1024x128xf32, #tpu.memory_space<vmem>>, %arg3: memref<1x128xf32, #tpu.memory_space<vmem>>, %arg4: memref<1xf32, #tpu.memory_space<smem>>) attributes {dimension_semantics = [], scalar_prefetch = 0 : i64, scratch_operands = 0 : i64, tpu.core_type = #tpu.core_type<tc>} {
    %c0 = arith.constant 0 : index
    %c0_0 = arith.constant 0 : index
    %0 = vector.load %arg0[%c0, %c0_0] : memref<4x1024xf32, #tpu.memory_space<vmem>>, vector<4x1024xf32>
    %c0_1 = arith.constant 0 : index
    %c0_2 = arith.constant 0 : index
    %1 = vector.load %arg2[%c0_1, %c0_2] : memref<1024x128xf32, #tpu.memory_space<vmem>>, vector<1024x128xf32>
    %cst = arith.constant dense<0.000000e+00> : vector<4x128xf32>
    %2 = tpu.matmul %0, %1, %cst {dimension_numbers = #tpu.dot_dimension_numbers<[1], [0], [0], [1], [0, 0, 1, 1], [], []>, precision = #tpu.contract_precision<fp32>} : vector<4x1024xf32>, vector<1024x128xf32>, vector<4x128xf32> -> vector<4x128xf32>
    %c0_3 = arith.constant 0 : index
    %c0_4 = arith.constant 0 : index
    %3 = vector.load %arg1[%c0_3, %c0_4] : memref<4x128xf32, #tpu.memory_space<vmem>>, vector<4x128xf32>
    %4 = arith.subf %2, %3 : vector<4x128xf32>
    %5 = arith.mulf %4, %4 : vector<4x128xf32>
    %6 = vector.extract_strided_slice %5 {offsets = [0, 0], sizes = [2, 128], strides = [1, 1]} : vector<4x128xf32> to vector<2x128xf32>
    %7 = vector.extract_strided_slice %5 {offsets = [2, 0], sizes = [2, 128], strides = [1, 1]} : vector<4x128xf32> to vector<2x128xf32>
    %8 = arith.addf %6, %7 : vector<2x128xf32>
    %9 = math.sqrt %8 : vector<2x128xf32>
    %c0_5 = arith.constant 0 : index
    %c0_6 = arith.constant 0 : index
    %10 = vector.load %arg3[%c0_5, %c0_6] : memref<1x128xf32, #tpu.memory_space<vmem>>, vector<1x128xf32>
    %11 = vector.broadcast %10 : vector<1x128xf32> to vector<2x128xf32>
    %12 = arith.mulf %9, %11 : vector<2x128xf32>
    %13 = vector.shape_cast %12 : vector<2x128xf32> to vector<1x2x128xf32>
    %cst_7 = arith.constant dense<0.000000e+00> : vector<1xf32>
    %14 = vector.multi_reduction <add>, %13, %cst_7 [1, 2] : vector<1x2x128xf32> to vector<1xf32>
    %15 = vector.shape_cast %14 : vector<1xf32> to vector<1x1x1xf32>
    %16 = vector.extract %15[0, 0, 0] : f32 from vector<1x1x1xf32>
    %c0_8 = arith.constant 0 : index
    %17 = memref.load %arg4[%c0_8] : memref<1xf32, #tpu.memory_space<smem>>
    memref.store %16, %arg4[%c0_8] : memref<1xf32, #tpu.memory_space<smem>>
    return
  }
}

</mosaic_0001>

<bundles_post_ra>
// kernel: tpu_custom_call.1
= control target key start
LH: loop header
LB: loop body
LE: loop exit
PB: predicated region body
PF: predicated region fallthrough
CT: control target
= control target key end

     0   :  { %9 = vsyncpa [#allocation3], 0  ;;  %s7393_s0 = inlined_call_operand.hbm [shape: f32[4,1024], index: 0, kind: input, shape index: {}]   ;;  %s7394_s1 = inlined_call_operand.hbm [shape: f32[4,128], index: 1, kind: input, shape index: {}]   ;;  %s7395_s2 = inlined_call_operand.hbm [shape: f32[1024,128], index: 2, kind: input, shape index: {}]   ;;  %s7396_s3 = inlined_call_operand.vmem [shape: f32[1,128], index: 3, kind: input, shape index: {}]   ;;  %s7397_s4 = inlined_call_operand.hbm [shape: f32[1], index: 4, kind: output, shape index: {}]  }
   0x1   :  { %10 = vsyncpa [#allocation6], 0 }
   0x2   :  { %11 = vsyncpa [#allocation4], 0  ;;  %s5402_s15 = smov [#allocation5]   ;;  %s5403_s17 = smov [#allocation2]  }
   0x3   :  { %s28_s16 = sshll.u32 %s5402_s15, 4  ;;  %s18_s18 = sshll.u32 %s5403_s17, 4  ;;  %s29_s16 = int_to_ptr.vmem [resolvable:$true] %s28_s16  ;;  %s19_s18 = int_to_ptr.vmem [resolvable:$true] %s18_s18 }
   0x4   :  { %s5320_s21 = scalar_lea.hbm %s7394_s1, 64 }
   0x5   :  { %p5321_p0 = scmp.ne.s32.totalorder %s7394_s1, %s5320_s21  ;;  %p5324_p1 = scmp.lt.u32.totalorder %s5320_s21, %s7394_s1 }
   0x7   :  { %p5326_p2 = pnand %p5324_p1, %p5321_p0 }
   0x9   :  { %5329 = shalt.err (!%p5326_p2)
}
   0xa   :  { %s5330_s26 = scalar_lea.vmem %s29_s16, 64  ;;  %p5335_p4 = scmp.lt.s32.totalorder %s29_s16, %s29_s16 }
   0xb   :  { %p5331_p3 = scmp.ne.s32.totalorder %s29_s16, %s5330_s26  ;;  %p5336_p5 = scmp.lt.s32.totalorder %s5330_s26, %s5330_s26 }
   0xd   :  { %p5337_p6 = por %p5336_p5, %p5335_p4 }
   0xf   :  { %p5338_p7 = pnand %p5337_p6, %p5331_p3 }
  0x11   :  { %5341 = shalt.err (!%p5338_p7)
}
  0x12   :  { %31 = dma.hbm_to_vmem [thread:$0]  %s7394_s1, 64, %s29_s16, [#allocation6]  }
  0x13   :  { %s5342_s5 = scalar_lea.hbm %s7393_s0, 512 }
  0x14   :  { %p5343_p8 = scmp.ne.s32.totalorder %s7393_s0, %s5342_s5  ;;  %p5346_p9 = scmp.lt.u32.totalorder %s5342_s5, %s7393_s0 }
  0x16   :  { %p5348_p10 = pnand %p5346_p9, %p5343_p8 }
  0x18   :  { %5351 = shalt.err (!%p5348_p10)
}
  0x19   :  { %s5352_s10 = scalar_lea.vmem %s19_s18, 512  ;;  %p5357_p12 = scmp.lt.s32.totalorder %s19_s18, %s19_s18 }
  0x1a   :  { %p5353_p11 = scmp.ne.s32.totalorder %s19_s18, %s5352_s10  ;;  %p5358_p13 = scmp.lt.s32.totalorder %s5352_s10, %s5352_s10 }
  0x1c   :  { %p5359_p0 = por %p5358_p13, %p5357_p12 }
  0x1e   :  { %p5360_p1 = pnand %p5359_p0, %p5353_p11 }
  0x20   :  { %5363 = shalt.err (!%p5360_p1)
}
  0x21   :  { %21 = dma.hbm_to_vmem [thread:$0]  %s7393_s0, 512, %s19_s18, [#allocation3]  }
  0x22   :  { %s5404_s12 = smov [#allocation7]   ;;  %s5364_s16 = scalar_lea.hbm %s7395_s2, 16384 }
  0x23   :  { %s37_s13 = sshll.u32 %s5404_s12, 4  ;;  %p5365_p2 = scmp.ne.s32.totalorder %s7395_s2, %s5364_s16  ;;  %s38_s13 = int_to_ptr.vmem [resolvable:$true] %s37_s13 }
  0x24   :  { %p5368_p3 = scmp.lt.u32.totalorder %s5364_s16, %s7395_s2 }
  0x26   :  { %p5370_p4 = pnand %p5368_p3, %p5365_p2 }
  0x28   :  { %5373 = shalt.err (!%p5370_p4)
}
  0x29   :  { %s5374_s22 = scalar_lea.vmem %s38_s13, 16384  ;;  %p5379_p6 = scmp.lt.s32.totalorder %s38_s13, %s38_s13 }
  0x2a   :  { %p5375_p5 = scmp.ne.s32.totalorder %s38_s13, %s5374_s22  ;;  %p5380_p7 = scmp.lt.s32.totalorder %s5374_s22, %s5374_s22 }
  0x2c   :  { %p5381_p8 = por %p5380_p7, %p5379_p6 }
  0x2e   :  { %p5382_p9 = pnand %p5381_p8, %p5375_p5 }
  0x30   :  { %5385 = shalt.err (!%p5382_p9)
}
  0x31   :  { %s5405_s0 = smov 128   ;;  %s5406_s18 = smov 8  }
  0x32   :  { %43 = dma.hbm_to_vmem [thread:$0]  %s7395_s2, 16384, %s38_s13, [#allocation6], %s5405_s0, %s5405_s0, %s5406_s18  }
  0x33   :  { %5396 = dma.done.wait [#allocation3], 512  }
  0x34   :  { %5397 = vsyncadd [#allocation3], 4294966784 }
  0x35   :  { %5398 = dma.done.wait [#allocation6], 16448  }
  0x36   :  { %5399 = vsyncadd [#allocation6], 4294950848  ;;  %v75_v0 = vld [vmem:[#allocation7 + $0x80] sm:$0xff]  ;;  %v76_v1 = vld [vmem:[#allocation7 + $0x88] sm:$0xff]  ;;  %vm3669_vm2 = vcmask 1041408  }
  0x37   :  { %v59_v2 = vld [vmem:[#allocation7] sm:$0xff]  ;;  %v248_v3 = vand.u32 4294901760, %v75_v0  ;;  %v251_v4 = vand.u32 4294901760, %v76_v1  ;;  %v60_v5 = vld [vmem:[#allocation7 + $0x8] sm:$0xff]  ;;  %v77_v7 = vld [vmem:[#allocation7 + $0x90] sm:$0xff] }
  0x38   :  { %v200_v6 = vand.u32 4294901760, %v59_v2  ;;  %v78_v8 = vld [vmem:[#allocation7 + $0x98] sm:$0xff]  ;;  %v203_v9 = vand.u32 4294901760, %v60_v5  ;;  %v254_v10 = vand.u32 4294901760, %v77_v7  ;;  %v61_v12 = vld [vmem:[#allocation7 + $0x10] sm:$0xff]  ;;  %v79_v18 = vld [vmem:[#allocation7 + $0xa0] sm:$0xff] }
  0x39   :  { %v257_v11 = vand.u32 4294901760, %v78_v8  ;;  %v62_v13 = vld [vmem:[#allocation7 + $0x18] sm:$0xff]  ;;  %v5469_v14 = vpack.c.bf16 %v251_v4, %v248_v3  ;;  %v206_v16 = vand.u32 4294901760, %v61_v12  ;;  %v80_v19 = vld [vmem:[#allocation7 + $0xa8] sm:$0xff]  ;;  %v63_v23 = vld [vmem:[#allocation7 + $0x20] sm:$0xff]  ;;  %v260_v29 = vand.u32 4294901760, %v79_v18 }
  0x3a   :  { %v5471_v15 = vsub.f32 %v59_v2, %v200_v6  ;;  %v209_v17 = vand.u32 4294901760, %v62_v13  ;;  %v5473_v20 = vpack.c.bf16 %v203_v9, %v200_v6  ;;  %v5475_v21 = vsub.f32 %v60_v5, %v203_v9  ;;  %v64_v24 = vld [vmem:[#allocation7 + $0x28] sm:$0xff]  ;;  %v81_v37 = vld [vmem:[#allocation7 + $0xb0] sm:$0xff]  ;;  %v82_v42 = vld [vmem:[#allocation7 + $0xb8] sm:$0xff] }
  0x3b   :  { %v5477_v22 = vpack.c.bf16 %v257_v11, %v254_v10  ;;  %4539 = vmatprep.subr.bf16.mxu0 %v5469_v14  ;;  %v5480_v25 = vsub.f32 %v77_v7, %v254_v10  ;;  %v5482_v26 = vsub.f32 %v78_v8, %v257_v11  ;;  %v5486_v28 = vsub.f32 %v61_v12, %v206_v16  ;;  %v65_v55 = vld [vmem:[#allocation7 + $0x30] sm:$0xff]  ;;  %v66_v56 = vld [vmem:[#allocation7 + $0x38] sm:$0xff]  ;;  %v83_v5 = vld [vmem:[#allocation7 + $0xc0] sm:$0xff] }
  0x3c   :  { %v5484_v27 = vpack.c.bf16 %v209_v17, %v206_v16  ;;  %4541 = vmatpush3.bf16.msra.mxu0 %v5473_v20  ;;  %v263_v30 = vand.u32 4294901760, %v80_v19  ;;  %v5489_v31 = vsub.f32 %v75_v0, %v248_v3  ;;  %v5491_v32 = vsub.f32 %v76_v1, %v251_v4  ;;  %v84_v6 = vld [vmem:[#allocation7 + $0xc8] sm:$0xff]  ;;  %v67_v11 = vld [vmem:[#allocation7 + $0x40] sm:$0xff] }
  0x3d   :  { %4543 = vmatprep.subr.bf16.mxu0 %v5477_v22  ;;  %v212_v33 = vand.u32 4294901760, %v63_v23  ;;  %v215_v34 = vand.u32 4294901760, %v64_v24  ;;  %v7413_v35 = vand.u32 4294901760, %v5471_v15  ;;  %v7412_v36 = vand.u32 4294901760, %v5475_v21 }
  0x3e   :  { %v5496_v38 = vsub.f32 %v62_v13, %v209_v17  ;;  %v5498_v39 = vpack.c.bf16 %v263_v30, %v260_v29  ;;  %v5500_v40 = vsub.f32 %v79_v18, %v260_v29  ;;  %v7417_v41 = vand.u32 4294901760, %v5489_v31  ;;  %v68_v29 = vld [vmem:[#allocation7 + $0x48] sm:$0xff] }
  0x3f   :  { %v5503_v43 = vsub.f32 %v80_v19, %v263_v30  ;;  %v7415_v44 = vand.u32 4294901760, %v5491_v32  ;;  %v5506_v45 = vpack.c.bf16 %v215_v34, %v212_v33  ;;  %v5508_v46 = vsub.f32 %v63_v23, %v212_v33 }
  0x40   :  { %4545 = vmatpush3.bf16.msra.mxu0 %v5484_v27  ;;  %v427_v47 = vsub.f32 %v5489_v31, %v7417_v41  ;;  %v315_v48 = vsub.f32 %v5471_v15, %v7413_v35  ;;  %v322_v49 = vsub.f32 %v5475_v21, %v7412_v36  ;;  %v266_v50 = vand.u32 4294901760, %v81_v37  ;;  %v55_v41 = vld [vmem:[#allocation2] sm:$0xff] }
  0x41   :  { %4547 = vmatprep.subr.bf16.mxu0 %v5498_v39  ;;  %v434_v51 = vsub.f32 %v5491_v32, %v7415_v44  ;;  %v269_v52 = vand.u32 4294901760, %v82_v42  ;;  %v7410_v53 = vand.u32 4294901760, %v5480_v25  ;;  %v7408_v54 = vand.u32 4294901760, %v5482_v26 }
  0x42   :  { %v428_v57 = vand.u32 4294901760, %v427_v47  ;;  %v5526_v58 = vsub.f32 %v64_v24, %v215_v34  ;;  %v316_v59 = vand.u32 4294901760, %v315_v48  ;;  %v323_v60 = vand.u32 4294901760, %v322_v49 }
  0x43   :  { %v435_v61 = vand.u32 4294901760, %v434_v51  ;;  %v5528_v62 = vpack.c.bf16 %v269_v52, %v266_v50  ;;  %v5530_v63 = vsub.f32 %v81_v37, %v266_v50  ;;  %v441_v0 = vsub.f32 %v5480_v25, %v7410_v53 }
  0x44   :  { %4549 = vmatpush3.bf16.msra.mxu0 %v5506_v45  ;;  %v4572_v1 = vpack.c.bf16 %v323_v60, %v316_v59  ;;  %v448_v2 = vsub.f32 %v5482_v26, %v7408_v54  ;;  %v218_v3 = vand.u32 4294901760, %v65_v55  ;;  %v221_v4 = vand.u32 4294901760, %v66_v56  ;;  %v86_v59 = vld [vmem:[#allocation7 + $0xd8] sm:$0xff] }
  0x45   :  { %v4570_v7 = vpack.c.bf16 %v435_v61, %v428_v57  ;;  %4551 = vmatprep.subr.bf16.mxu0 %v5528_v62  ;;  %v442_v8 = vand.u32 4294901760, %v441_v0  ;;  %v7407_v9 = vand.u32 4294901760, %v5486_v28  ;;  %v7405_v10 = vand.u32 4294901760, %v5496_v38  ;;  %v85_v57 = vld [vmem:[#allocation7 + $0xd0] sm:$0xff]  ;;  %v90_v54 = vld [vmem:[#allocation7 + $0xf8] sm:$0xff] }
  0x46   :  { %v5542_v12 = vsub.f32 %v82_v42, %v269_v52  ;;  %v449_v13 = vand.u32 4294901760, %v448_v2  ;;  %v5544_v16 = vpack.c.bf16 %v221_v4, %v218_v3  ;;  %v5546_v17 = vsub.f32 %v65_v55, %v218_v3 }
  0x47   :  { %4571 = vmatprep.subr.bf16.mxu1 %v4570_v7  ;;  %v329_v18 = vsub.f32 %v5486_v28, %v7407_v9  ;;  %v336_v19 = vsub.f32 %v5496_v38, %v7405_v10  ;;  %v272_v23 = vand.u32 4294901760, %v83_v5  ;;  %v275_v24 = vand.u32 4294901760, %v84_v6  ;;  %v89_v9 = vld [vmem:[#allocation7 + $0xf0] sm:$0xff] }
  0x48   :  { %4573 = vmatpush3.bf16.msra.mxu1 %v4572_v1  ;;  %v4574_v30 = vpack.c.bf16 %v449_v13, %v442_v8  ;;  %4553 = vmatpush3.bf16.msra.mxu0 %v5544_v16  ;;  %v7403_v33 = vand.u32 4294901760, %v5500_v40  ;;  %v7402_v34 = vand.u32 4294901760, %v5503_v43  ;;  %v224_v37 = vand.u32 4294901760, %v67_v11  ;;  %v69_v1 = vld [vmem:[#allocation7 + $0x50] sm:$0xff] }
  0x49   :  { %v5557_v42 = vsub.f32 %v66_v56, %v221_v4  ;;  %v330_v47 = vand.u32 4294901760, %v329_v18  ;;  %v337_v48 = vand.u32 4294901760, %v336_v19  ;;  %v5559_v49 = vpack.c.bf16 %v275_v24, %v272_v23  ;;  %v70_v18 = vld [vmem:[#allocation7 + $0x58] sm:$0xff] }
  0x4a   :  { %4575 = vmatprep.subr.bf16.mxu1 %v4574_v30  ;;  %v5561_v50 = vsub.f32 %v83_v5, %v272_v23  ;;  %v455_v51 = vsub.f32 %v5500_v40, %v7403_v33  ;;  %v462_v52 = vsub.f32 %v5503_v43, %v7402_v34  ;;  %v227_v55 = vand.u32 4294901760, %v68_v29 }
  0x4b   :  { %v4576_v56 = vpack.c.bf16 %v337_v48, %v330_v47  ;;  %4555 = vmatprep.subr.bf16.mxu0 %v5559_v49  ;;  %v5570_v60 = vsub.f32 %v84_v6, %v275_v24  ;;  %v7400_v61 = vand.u32 4294901760, %v5508_v46  ;;  %v7398_v0 = vand.u32 4294901760, %v5526_v58 }
  0x4c   :  { %v456_v2 = vand.u32 4294901760, %v455_v51  ;;  %v463_v3 = vand.u32 4294901760, %v462_v52  ;;  %v5574_v4 = vpack.c.bf16 %v227_v55, %v224_v37  ;;  %v5576_v5 = vsub.f32 %v67_v11, %v224_v37 }
  0x4d   :  { %4577 = vmatpush3.bf16.msra.mxu1 %v4576_v56  ;;  %v343_v7 = vsub.f32 %v5508_v46, %v7400_v61  ;;  %v350_v6 = vsub.f32 %v5526_v58, %v7398_v0  ;;  %v278_v8 = vand.u32 4294901760, %v85_v57  ;;  %v281_v13 = vand.u32 4294901760, %v86_v59  ;;  %v88_v0 = vld [vmem:[#allocation7 + $0xe8] sm:$0xff] }
  0x4e   :  { %v4578_v19 = vpack.c.bf16 %v463_v3, %v456_v2  ;;  %4557 = vmatpush3.bf16.msra.mxu0 %v5574_v4  ;;  %v7399_v23 = vand.u32 4294901760, %v5530_v63  ;;  %v7401_v11 = vand.u32 4294901760, %v5542_v12  ;;  %v230_v24 = vand.u32 4294901760, %v69_v1  ;;  %v87_v3 = vld [vmem:[#allocation7 + $0xe0] sm:$0xff] }
  0x4f   :  { %v5587_v30 = vsub.f32 %v68_v29, %v227_v55  ;;  %v344_v37 = vand.u32 4294901760, %v343_v7  ;;  %v351_v47 = vand.u32 4294901760, %v350_v6  ;;  %v5589_v48 = vpack.c.bf16 %v281_v13, %v278_v8  ;;  %v71_v6 = vld [vmem:[#allocation7 + $0x60] sm:$0xff] }
  0x50   :  { %4579 = vmatprep.subr.bf16.mxu1 %v4578_v19  ;;  %v5591_v51 = vsub.f32 %v85_v57, %v278_v8  ;;  %v469_v52 = vsub.f32 %v5530_v63, %v7399_v23  ;;  %v476_v56 = vsub.f32 %v5542_v12, %v7401_v11  ;;  %v233_v2 = vand.u32 4294901760, %v70_v18  ;;  %v72_v11 = vld [vmem:[#allocation7 + $0x68] sm:$0xff] }
  0x51   :  { %v4580_v29 = vpack.c.bf16 %v351_v47, %v344_v37  ;;  %4559 = vmatprep.subr.bf16.mxu0 %v5589_v48  ;;  %v5600_v55 = vsub.f32 %v86_v59, %v281_v13  ;;  %v7404_v7 = vand.u32 4294901760, %v5546_v17  ;;  %v7406_v57 = vand.u32 4294901760, %v5557_v42 }
  0x52   :  { %v470_v8 = vand.u32 4294901760, %v469_v52  ;;  %v477_v19 = vand.u32 4294901760, %v476_v56  ;;  %v5604_v23 = vpack.c.bf16 %v233_v2, %v230_v24  ;;  %v5606_v61 = vsub.f32 %v69_v1, %v230_v24 }
  0x53   :  { %4581 = vmatpush3.bf16.msra.mxu1 %v4580_v29  ;;  %v357_v37 = vsub.f32 %v5546_v17, %v7404_v7  ;;  %v364_v59 = vsub.f32 %v5557_v42, %v7406_v57  ;;  %v284_v13 = vand.u32 4294901760, %v87_v3  ;;  %v287_v47 = vand.u32 4294901760, %v88_v0 }
  0x54   :  { %v4582_v34 = vpack.c.bf16 %v477_v19, %v470_v8  ;;  %4561 = vmatpush3.bf16.msra.mxu0 %v5604_v23  ;;  %v7409_v52 = vand.u32 4294901760, %v5561_v50  ;;  %v7411_v1 = vand.u32 4294901760, %v5570_v60  ;;  %v236_v24 = vand.u32 4294901760, %v71_v6 }
  0x55   :  { %v5617_v56 = vsub.f32 %v70_v18, %v233_v2  ;;  %v358_v29 = vand.u32 4294901760, %v357_v37  ;;  %v365_v33 = vand.u32 4294901760, %v364_v59  ;;  %v5619_v7 = vpack.c.bf16 %v287_v47, %v284_v13  ;;  %v73_v37 = vld [vmem:[#allocation7 + $0x70] sm:$0xff] }
  0x56   :  { %4583 = vmatprep.subr.bf16.mxu1 %v4582_v34  ;;  %v5621_v10 = vsub.f32 %v87_v3, %v284_v13  ;;  %v483_v8 = vsub.f32 %v5561_v50, %v7409_v52  ;;  %v490_v19 = vsub.f32 %v5570_v60, %v7411_v1  ;;  %v239_v57 = vand.u32 4294901760, %v72_v11  ;;  %v74_v1 = vld [vmem:[#allocation7 + $0x78] sm:$0xff] }
  0x57   :  { %7591 = vst [vmem:[#allocation12_spill] sm:$0xff] %v5619_v7  ;;  %v4584_v18 = vpack.c.bf16 %v365_v33, %v358_v29  ;;  %4563 = vmatprep.subr.bf16.mxu0 %v5619_v7  ;;  %v5630_v2 = vsub.f32 %v88_v0, %v287_v47  ;;  %v7414_v34 = vand.u32 4294901760, %v5576_v5  ;;  %v7416_v3 = vand.u32 4294901760, %v5587_v30 }
  0x58   :  { %v484_v59 = vand.u32 4294901760, %v483_v8  ;;  %v491_v13 = vand.u32 4294901760, %v490_v19  ;;  %v5634_v52 = vpack.c.bf16 %v239_v57, %v236_v24  ;;  %v5636_v53 = vsub.f32 %v71_v6, %v236_v24 }
  0x59   :  { %4585 = vmatpush3.bf16.msra.mxu1 %v4584_v18  ;;  %v371_v33 = vsub.f32 %v5576_v5, %v7414_v34  ;;  %v378_v0 = vsub.f32 %v5587_v30, %v7416_v3  ;;  %v290_v47 = vand.u32 4294901760, %v89_v9  ;;  %v293_v29 = vand.u32 4294901760, %v90_v54 }
  0x5a   :  { %7592 = vst [vmem:[#allocation13_spill] sm:$0xff] %v5634_v52  ;;  %v4586_v36 = vpack.c.bf16 %v491_v13, %v484_v59  ;;  %4565 = vmatpush3.bf16.msra.mxu0 %v5634_v52  ;;  %v7422_v8 = vand.u32 4294901760, %v5591_v51  ;;  %v7420_v6 = vand.u32 4294901760, %v5600_v55  ;;  %v242_v24 = vand.u32 4294901760, %v73_v37 }
  0x5b   :  { %v5647_v19 = vsub.f32 %v72_v11, %v239_v57  ;;  %v372_v18 = vand.u32 4294901760, %v371_v33  ;;  %v379_v35 = vand.u32 4294901760, %v378_v0  ;;  %v5649_v34 = vpack.c.bf16 %v293_v29, %v290_v47 }
  0x5c   :  { %4587 = vmatprep.subr.bf16.mxu1 %v4586_v36  ;;  %v5651_v44 = vsub.f32 %v89_v9, %v290_v47  ;;  %v497_v59 = vsub.f32 %v5591_v51, %v7422_v8  ;;  %v504_v13 = vsub.f32 %v5600_v55, %v7420_v6  ;;  %v245_v3 = vand.u32 4294901760, %v74_v1 }
  0x5d   :  { %7593 = vst [vmem:[#allocation14_spill] sm:$0xff] %v5649_v34  ;;  %v4588_v52 = vpack.c.bf16 %v379_v35, %v372_v18  ;;  %4567 = vmatprep.subr.bf16.mxu0 %v5649_v34  ;;  %v5660_v11 = vsub.f32 %v90_v54, %v293_v29  ;;  %v7421_v57 = vand.u32 4294901760, %v5606_v61  ;;  %v7423_v36 = vand.u32 4294901760, %v5617_v56 }
  0x5e   :  { %v498_v9 = vand.u32 4294901760, %v497_v59  ;;  %v505_v33 = vand.u32 4294901760, %v504_v13  ;;  %v5664_v0 = vpack.c.bf16 %v245_v3, %v242_v24  ;;  %v5666_v47 = vsub.f32 %v73_v37, %v242_v24 }
  0x5f   :  { %4589 = vmatpush3.bf16.msra.mxu1 %v4588_v52  ;;  %v385_v6 = vsub.f32 %v5606_v61, %v7421_v57  ;;  %v392_v35 = vsub.f32 %v5617_v56, %v7423_v36  ;;  %v191_v54 = vcombine.high %v55_v41, %v55_v41  ;;  %v5674_v29 = vand.u32 4294901760, %v55_v41 }
  0x60   :  { %7594 = vst [vmem:[#allocation15_spill] sm:$0xff] %v5664_v0  ;;  %v4590_v18 = vpack.c.bf16 %v505_v33, %v498_v9  ;;  %4569 = vmatpush3.bf16.msra.mxu0 %v5664_v0  ;;  %v7426_v59 = vand.u32 4294901760, %v5621_v10  ;;  %v7429_v37 = vand.u32 4294901760, %v5630_v2  ;;  %v4602_v52 = vpack.c.bf16 %v5491_v32, %v5489_v31 }
  0x61   :  { %v386_v24 = vand.u32 4294901760, %v385_v6  ;;  %v393_v13 = vand.u32 4294901760, %v392_v35  ;;  %v5681_v57 = vand.u32 4294901760, %v191_v54  ;;  %v5684_v8 = vsub.f32 %v55_v41, %v5674_v29 }
  0x62   :  { %4591 = vmatprep.subr.bf16.mxu1 %v4590_v18  ;;  %v511_v9 = vsub.f32 %v5621_v10, %v7426_v59  ;;  %v518_v33 = vsub.f32 %v5630_v2, %v7429_v37  ;;  %4603 = vmatprep.subr.bf16.mxu0 %v4602_v52  ;;  %v7430_v36 = vand.u32 4294901760, %v5636_v53  ;;  %v7431_v6 = vand.u32 4294901760, %v5647_v19 }
  0x63   :  { %7595 = vst [vmem:[#allocation16_spill] sm:$0xff] %v5681_v57  ;;  %7596 = vst [vmem:[#allocation17_spill] sm:$0xff] %v5684_v8  ;;  %v5694_v35 = vsub.f32 %v74_v1, %v245_v3  ;;  %v4592_v0 = vpack.c.bf16 %v393_v13, %v386_v24  ;;  %v5697_v41 = vsub.f32 %v191_v54, %v5681_v57  ;;  %v7434_v18 = vand.u32 4294901760, %v5684_v8 }
  0x64   :  { %536 = vmatprep.mubr.f32.mxu1 %v5681_v57  ;;  %v512_v59 = vand.u32 4294901760, %v511_v9  ;;  %v519_v34 = vand.u32 4294901760, %v518_v33  ;;  %v399_v52 = vsub.f32 %v5636_v53, %v7430_v36  ;;  %v406_v37 = vsub.f32 %v5647_v19, %v7431_v6 }
  0x65   :  { %4593 = vmatpush3.bf16.msra.mxu1 %v4592_v0  ;;  %v297_v1 = vand.u32 4294901760, %v5697_v41  ;;  %v304_v3 = vsub.f32 %v5684_v8, %v7434_v18  ;;  %v7439_v54 = vand.u32 4294901760, %v5651_v44  ;;  %v531_v24 = vand.u32 4294901760, %v5660_v11 }
  0x66   :  { %v4594_v13 = vpack.c.bf16 %v519_v34, %v512_v59  ;;  %v400_v9 = vand.u32 4294901760, %v399_v52  ;;  %v407_v33 = vand.u32 4294901760, %v406_v37  ;;  %v7440_v8 = vand.u32 4294901760, %v5666_v47 }
  0x67   :  { %v298_v36 = vsub.f32 %v5697_v41, %v297_v1  ;;  %v525_v6 = vsub.f32 %v5651_v44, %v7439_v54  ;;  %v532_v0 = vsub.f32 %v5660_v11, %v531_v24  ;;  %v305_v57 = vand.u32 4294901760, %v304_v3 }
  0x68   :  { %4595 = vmatprep.subr.bf16.mxu1 %v4594_v13  ;;  %v4596_v18 = vpack.c.bf16 %v407_v33, %v400_v9  ;;  %v419_v7 = vand.u32 4294901760, %v5694_v35  ;;  %v4604_v59 = vpack.c.bf16 %v5475_v21, %v5471_v15  ;;  %v4606_v54 = vpack.c.bf16 %v5482_v26, %v5480_v25 }
  0x69   :  { %v299_v34 = vand.u32 4294901760, %v298_v36  ;;  %v526_v37 = vand.u32 4294901760, %v525_v6  ;;  %v533_v52 = vand.u32 4294901760, %v532_v0  ;;  %v413_v13 = vsub.f32 %v5666_v47, %v7440_v8 }
  0x6a   :  { %4597 = vmatpush3.bf16.msra.mxu1 %v4596_v18  ;;  %v420_v3 = vsub.f32 %v5694_v35, %v419_v7  ;;  %v4608_v6 = vpack.c.bf16 %v5496_v38, %v5486_v28  ;;  %v4610_v18 = vpack.c.bf16 %v5503_v43, %v5500_v40  ;;  %v4612_v8 = vpack.c.bf16 %v5526_v58, %v5508_v46 }
  0x6b   :  { %300 = vmatprep.mubr.f32.mxu0 %v299_v34  ;;  %v4598_v9 = vpack.c.bf16 %v533_v52, %v526_v37  ;;  %v414_v36 = vand.u32 4294901760, %v413_v13  ;;  %v7597_v34 = vand.u32 4294901760, %v5489_v31  ;;  %v7600_v52 = vand.u32 4294901760, %v5475_v21 }
  0x6c   :  { %306 = vmatmul.mubr.f32.vlgmr.msra.gmra.mrb[0].mxu0 %v305_v57  ;;  %v421_v33 = vand.u32 4294901760, %v420_v3  ;;  %v7598_v57 = vand.u32 4294901760, %v5491_v32  ;;  %v7601_v3 = vand.u32 4294901760, %v5480_v25  ;;  %v7605_v31 = vand.u32 4294901760, %v5500_v40 }
  0x6d   :  { %4605 = vmatpush3.bf16.msra.mxu0 %v4604_v59  ;;  %4599 = vmatprep.subr.bf16.mxu1 %v4598_v9  ;;  %v7599_v59 = vand.u32 4294901760, %v5471_v15  ;;  %v7606_v32 = vand.u32 4294901760, %v5503_v43  ;;  %v7607_v15 = vand.u32 4294901760, %v5508_v46  ;;  %v7608_v21 = vand.u32 4294901760, %v5526_v58 }
  0x6e   :  { %4607 = vmatprep.subr.bf16.mxu0 %v4606_v54  ;;  %v4600_v0 = vpack.c.bf16 %v421_v33, %v414_v36  ;;  %673 = vmatprep.mubr.f32.mxu0 %v5697_v41  ;;  %v4666_v37 = vpack.c.bf16 %v7598_v57, %v7597_v34  ;;  %v7602_v54 = vand.u32 4294901760, %v5482_v26  ;;  %v7603_v36 = vand.u32 4294901760, %v5486_v28 }
  0x6f   :  { %v4668_v13 = vpack.c.bf16 %v7600_v52, %v7599_v59  ;;  %v7604_v33 = vand.u32 4294901760, %v5496_v38  ;;  %v5761_v34 = vpack.c.bf16 %v7606_v32, %v7605_v31  ;;  %v5767_v25 = vpack.c.bf16 %v7608_v21, %v7607_v15 }
  0x70   :  { %v4670_v9 = vpack.c.bf16 %v7602_v54, %v7601_v3  ;;  %4601 = vmatpush3.bf16.msra.mxu1 %v4600_v0  ;;  %v7609_v26 = vand.u32 4294901760, %v5530_v63  ;;  %v7610_v28 = vand.u32 4294901760, %v5542_v12  ;;  %v7611_v57 = vand.u32 4294901760, %v5546_v17 }
  0x71   :  { %v5755_v41 = vpack.c.bf16 %v7604_v33, %v7603_v36  ;;  %v7612_v40 = vand.u32 4294901760, %v5557_v42  ;;  %v7613_v0 = vand.u32 4294901760, %v5561_v50  ;;  %v7614_v46 = vand.u32 4294901760, %v5570_v60  ;;  %4609 = vmatpush3.bf16.msra.mxu0 %v4608_v6  ;;  %4635 = vmatprep.subr.bf16.mxu1 %v5469_v14 }
  0x72   :  { %v5773_v38 = vpack.c.bf16 %v7610_v28, %v7609_v26  ;;  %v7615_v58 = vand.u32 4294901760, %v5576_v5  ;;  %v7616_v52 = vand.u32 4294901760, %v5587_v30  ;;  %v7617_v54 = vand.u32 4294901760, %v5591_v51  ;;  %4611 = vmatprep.subr.bf16.mxu0 %v4610_v18 }
  0x73   :  { %v5779_v43 = vpack.c.bf16 %v7612_v40, %v7611_v57  ;;  %v5785_v59 = vpack.c.bf16 %v7614_v46, %v7613_v0  ;;  %v7618_v36 = vand.u32 4294901760, %v5600_v55  ;;  %v7619_v31 = vand.u32 4294901760, %v5606_v61  ;;  %538 = vmatmul.mubr.f32.vlgmr.msra.gmra.mrb[0].mxu1 %v5674_v29  ;;  %v7627_v0 = vld [vmem:[#allocation16_spill] sm:$0xff] }
  0x74   :  { %v5792_v3 = vpack.c.bf16 %v7616_v52, %v7615_v58  ;;  %v7620_v32 = vand.u32 4294901760, %v5617_v56  ;;  %v4614_v6 = vpack.c.bf16 %v5542_v12, %v5530_v63  ;;  %v7621_v21 = vand.u32 4294901760, %v5636_v53  ;;  %4637 = vmatpush3.bf16.msra.mxu1 %v5473_v20  ;;  %780 = vmatprep.mubr.f32.mxu1 %v297_v1  ;;  %v7626_v1 = vld [vmem:[#allocation14_spill] sm:$0xff]  ;;  %v7628_v52 = vld [vmem:[#allocation15_spill] sm:$0xff] }
  0x75   :  { %v5798_v33 = vpack.c.bf16 %v7618_v36, %v7617_v54  ;;  %v7622_v26 = vand.u32 4294901760, %v5647_v19  ;;  %4613 = vmatpush3.bf16.msra.mxu0 %v4612_v8  ;;  %4639 = vmatprep.subr.bf16.mxu1 %v5477_v22  ;;  %v4616_v18 = vpack.c.bf16 %v5557_v42, %v5546_v17  ;;  %v4618_v63 = vpack.c.bf16 %v5570_v60, %v5561_v50 }
  0x76   :  { %v5804_v15 = vpack.c.bf16 %v7620_v32, %v7619_v31  ;;  %4615 = vmatprep.subr.bf16.mxu0 %v4614_v6  ;;  %v4620_v12 = vpack.c.bf16 %v5587_v30, %v5576_v5  ;;  %v4622_v8 = vpack.c.bf16 %v5600_v55, %v5591_v51  ;;  %v4624_v17 = vpack.c.bf16 %v5617_v56, %v5606_v61  ;;  %v7623_v5 = vld [vmem:[#allocation12_spill] sm:$0xff]  ;;  %v108_v30 = vld [vmem:[#allocation7 + $0x188] sm:$0xff] }
  0x77   :  { %v5812_v28 = vpack.c.bf16 %v7622_v26, %v7621_v21  ;;  %v4626_v42 = vpack.c.bf16 %v5630_v2, %v5621_v10  ;;  %v4628_v50 = vpack.c.bf16 %v5647_v19, %v5636_v53  ;;  %v4630_v60 = vpack.c.bf16 %v5660_v11, %v5651_v44  ;;  %v107_v53 = vld [vmem:[#allocation7 + $0x180] sm:$0xff]  ;;  %v7624_v51 = vld [vmem:[#allocation17_spill] sm:$0xff]  ;;  %v93_v21 = vld [vmem:[#allocation7 + $0x110] sm:$0xff] }
  0x78   :  { %4641 = vmatpush3.bf16.msra.mxu1 %v5484_v27  ;;  %v4632_v61 = vpack.c.bf16 %v5694_v35, %v5666_v47  ;;  %v7625_v55 = vld [vmem:[#allocation13_spill] sm:$0xff]  ;;  %v91_v56 = vld [vmem:[#allocation7 + $0x100] sm:$0xff]  ;;  %v1110_v57 = vand.u32 4294901760, %v107_v53  ;;  %v1113_v40 = vand.u32 4294901760, %v108_v30  ;;  %v94_v26 = vld [vmem:[#allocation7 + $0x118] sm:$0xff]  ;;  %v1068_v11 = vand.u32 4294901760, %v93_v21 }
  0x79   :  { %4617 = vmatpush3.bf16.msra.mxu0 %v4616_v18  ;;  %4643 = vmatprep.subr.bf16.mxu1 %v5498_v39  ;;  %v92_v19 = vld [vmem:[#allocation7 + $0x108] sm:$0xff]  ;;  %v1062_v46 = vand.u32 4294901760, %v91_v56 }
  0x7a   :  { %4619 = vmatprep.subr.bf16.mxu0 %v4618_v63  ;;  %v1065_v58 = vand.u32 4294901760, %v92_v19  ;;  %v5852_v54 = vsub.f32 %v107_v53, %v1110_v57  ;;  %v5854_v36 = vsub.f32 %v108_v30, %v1113_v40 }
  0x7b   :  { %v5859_v31 = vsub.f32 %v91_v56, %v1062_v46 }
  0x7c   :  { %4645 = vmatpush3.bf16.msra.mxu1 %v5506_v45  ;;  %v5861_v32 = vsub.f32 %v92_v19, %v1065_v58 }
  0x7d   :  { %4621 = vmatpush3.bf16.msra.mxu0 %v4620_v12  ;;  %4647 = vmatprep.subr.bf16.mxu1 %v5528_v62  ;;  %v7632_v12 = vand.u32 4294901760, %v5651_v44  ;;  %v5892_v44 = vpack.c.bf16 %v1065_v58, %v1062_v46  ;;  %v5916_v46 = vsub.f32 %v93_v21, %v1068_v11 }
  0x7e   :  { %4623 = vmatprep.subr.bf16.mxu0 %v4622_v8 }
  0x7f   :  { %v5877_v8 = vpack.c.bf16 %v531_v24, %v7632_v12  ;;  %7634 = vst [vmem:[#allocation12_spill] sm:$0xff] %v5892_v44  ;;  %v1071_v24 = vand.u32 4294901760, %v94_v26 }
  0x80   :  { %4649 = vmatpush3.bf16.msra.mxu1 %v5544_v16 }
  0x81   :  { %4625 = vmatpush3.bf16.msra.mxu0 %v4624_v17  ;;  %4651 = vmatprep.subr.bf16.mxu1 %v5559_v49  ;;  %v7450_v17 = vand.u32 4294901760, %v5852_v54 }
  0x82   :  { %4627 = vmatprep.subr.bf16.mxu0 %v4626_v42  ;;  %v7448_v42 = vand.u32 4294901760, %v5854_v36 }
  0x83   :  { %v1289_v56 = vsub.f32 %v5852_v54, %v7450_v17 }
  0x84   :  { %4653 = vmatpush3.bf16.msra.mxu1 %v5574_v4 }
  0x85   :  { %4629 = vmatpush3.bf16.msra.mxu0 %v4628_v50  ;;  %4655 = vmatprep.subr.bf16.mxu1 %v5589_v48  ;;  %v96_v50 = vld [vmem:[#allocation7 + $0x128] sm:$0xff] }
  0x86   :  { %4631 = vmatprep.subr.bf16.mxu0 %v4630_v60  ;;  %v7446_v60 = vand.u32 4294901760, %v5859_v31 }
  0x88   :  { %4657 = vmatpush3.bf16.msra.mxu1 %v5604_v23 }
  0x89   :  { %4633 = vmatpush3.bf16.msra.mxu0 %v4632_v61  ;;  %4659 = vmatprep.subr.bf16.mxu1 %v7623_v5  ;;  %v7444_v61 = vand.u32 4294901760, %v5861_v32 }
  0x8a   :  { %4667 = vmatprep.subr.bf16.mxu0 %v4666_v37  ;;  %v109_v37 = vld [vmem:[#allocation7 + $0x190] sm:$0xff] }
  0x8b   :  { %v1116_v6 = vand.u32 4294901760, %v109_v37 }
  0x8c   :  { %676 = vmatmul.mubr.f32.vlgmr.msra.gmra.mrb[2].mxu0 %v7624_v51  ;;  %4661 = vmatpush3.bf16.msra.mxu1 %v7625_v55 }
  0x8d   :  { %4669 = vmatpush3.bf16.msra.mxu0 %v4668_v13  ;;  %4663 = vmatprep.subr.bf16.mxu1 %v7626_v1  ;;  %v110_v13 = vld [vmem:[#allocation7 + $0x198] sm:$0xff]  ;;  %v5894_v35 = vsub.f32 %v109_v37, %v1116_v6 }
  0x8e   :  { %4671 = vmatprep.subr.bf16.mxu0 %v4670_v9  ;;  %950 = vmatprep.mubr.f32.mxu0 %v7627_v0  ;;  %v7629_v9 = vand.u32 4294901760, %v7624_v51  ;;  %v1119_v63 = vand.u32 4294901760, %v110_v13 }
  0x90   :  { %4665 = vmatpush3.bf16.msra.mxu1 %v7628_v52  ;;  %v5899_v53 = vpack.c.bf16 %v1119_v63, %v1116_v6 }
  0x91   :  { %4673 = vmatpush3.bf16.msra.mxu0 %v5755_v41  ;;  %4699 = vmatprep.subr.bf16.mxu1 %v5469_v14  ;;  %v7630_v14 = vand.u32 4294901760, %v5621_v10  ;;  %v7631_v41 = vand.u32 4294901760, %v5630_v2  ;;  %v112_v2 = vld [vmem:[#allocation7 + $0x1a8] sm:$0xff] }
  0x92   :  { %4675 = vmatprep.subr.bf16.mxu0 %v5761_v34  ;;  %v111_v34 = vld [vmem:[#allocation7 + $0x1a0] sm:$0xff]  ;;  %v1125_v30 = vand.u32 4294901760, %v112_v2 }
  0x93   :  { %784 = vmatmul.mubr.f32.vlgmr.msra.gmra.mrb[2].mxu1 %v7629_v9  ;;  %v5868_v18 = vpack.c.bf16 %v7631_v41, %v7630_v14  ;;  %v1184_v9 = vsub.f32 %v5861_v32, %v7444_v61  ;;  %v1290_v41 = vand.u32 4294901760, %v1289_v56  ;;  %v100_v61 = vld [vmem:[#allocation7 + $0x148] sm:$0xff] }
  0x94   :  { %4701 = vmatpush3.bf16.msra.mxu1 %v5473_v20  ;;  %1054 = vmatprep.mubr.f32.mxu1 %v7627_v0  ;;  %v7633_v20 = vand.u32 4294901760, %v5666_v47  ;;  %v95_v47 = vld [vmem:[#allocation7 + $0x120] sm:$0xff]  ;;  %v5914_v0 = vpack.c.bf16 %v1071_v24, %v1068_v11  ;;  %v5934_v21 = vsub.f32 %v112_v2, %v1125_v30  ;;  %v98_v11 = vld [vmem:[#allocation7 + $0x138] sm:$0xff] }
  0x95   :  { %4677 = vmatpush3.bf16.msra.mxu0 %v5767_v25  ;;  %4703 = vmatprep.subr.bf16.mxu1 %v5477_v22  ;;  %v5887_v25 = vld [vmem:[#allocation2 + $0x8] sm:$0xff]  ;;  %v5890_v22 = vpack.c.bf16 %v1113_v40, %v1110_v57  ;;  %v1074_v19 = vand.u32 4294901760, %v95_v47  ;;  %v1077_v57 = vand.u32 4294901760, %v96_v50  ;;  %v113_v40 = vld [vmem:[#allocation7 + $0x1b0] sm:$0xff] }
  0x96   :  { %v5883_v10 = vpack.c.bf16 %v419_v7, %v7633_v20  ;;  %4679 = vmatprep.subr.bf16.mxu0 %v5773_v38  ;;  %v1122_v7 = vand.u32 4294901760, %v111_v34  ;;  %v5901_v38 = vsub.f32 %v110_v13, %v1119_v63  ;;  %v192_v51 = vcombine.high %v5887_v25, %v5887_v25  ;;  %7635 = vst [vmem:[#allocation17_spill] sm:$0xff] %v5914_v0  ;;  %v97_v20 = vld [vmem:[#allocation7 + $0x130] sm:$0xff] }
  0x97   :  { %v1177_v13 = vsub.f32 %v5859_v31, %v7446_v60  ;;  %v5944_v2 = vsub.f32 %v96_v50, %v1077_v57  ;;  %v1080_v50 = vand.u32 4294901760, %v97_v20 }
  0x98   :  { %4705 = vmatpush3.bf16.msra.mxu1 %v5484_v27  ;;  %v1296_v27 = vsub.f32 %v5854_v36, %v7448_v42  ;;  %v5920_v58 = vand.u32 4294901760, %v192_v51  ;;  %v5922_v37 = vsub.f32 %v111_v34, %v1122_v7  ;;  %v5932_v6 = vpack.c.bf16 %v1125_v30, %v1122_v7 }
  0x99   :  { %4681 = vmatpush3.bf16.msra.mxu0 %v5779_v43  ;;  %4707 = vmatprep.subr.bf16.mxu1 %v5498_v39  ;;  %v5918_v43 = vsub.f32 %v94_v26, %v1071_v24  ;;  %v114_v39 = vld [vmem:[#allocation7 + $0x1b8] sm:$0xff]  ;;  %v1128_v26 = vand.u32 4294901760, %v113_v40  ;;  %v7441_v14 = vand.u32 4294901760, %v5901_v38  ;;  %v5939_v34 = vpack.c.bf16 %v1077_v57, %v1074_v19 }
  0x9a   :  { %4683 = vmatprep.subr.bf16.mxu0 %v5785_v59  ;;  %7636 = vst [vmem:[#allocation13_spill] sm:$0xff] %v5920_v58  ;;  %v7443_v59 = vand.u32 4294901760, %v5894_v35  ;;  %7637 = vst [vmem:[#allocation14_spill] sm:$0xff] %v5932_v6  ;;  %v1297_v63 = vand.u32 4294901760, %v1296_v27  ;;  %v1131_v12 = vand.u32 4294901760, %v114_v39  ;;  %v7442_v24 = vand.u32 4294901760, %v5916_v46 }
  0x9b   :  { %7638 = vst [vmem:[#allocation16_spill] sm:$0xff] %v5939_v34  ;;  %v5948_v7 = vsub.f32 %v192_v51, %v5920_v58  ;;  %v7445_v56 = vand.u32 4294901760, %v5918_v43  ;;  %v1083_v27 = vand.u32 4294901760, %v98_v11  ;;  %v115_v51 = vld [vmem:[#allocation7 + $0x1c0] sm:$0xff] }
  0x9c   :  { %4709 = vmatpush3.bf16.msra.mxu1 %v5506_v45  ;;  %v5942_v45 = vsub.f32 %v95_v47, %v1074_v19  ;;  %v1303_v30 = vsub.f32 %v5894_v35, %v7443_v59  ;;  %v1310_v47 = vsub.f32 %v5901_v38, %v7441_v14  ;;  %v5962_v19 = vpack.c.bf16 %v1297_v63, %v1290_v41 }
  0x9d   :  { %4685 = vmatpush3.bf16.msra.mxu0 %v5792_v3  ;;  %4711 = vmatprep.subr.bf16.mxu1 %v5528_v62  ;;  %v1178_v3 = vand.u32 4294901760, %v1177_v13  ;;  %v1185_v62 = vand.u32 4294901760, %v1184_v9  ;;  %v5964_v57 = vpack.c.bf16 %v1131_v12, %v1128_v26  ;;  %v5966_v13 = vsub.f32 %v114_v39, %v1131_v12 }
  0x9e   :  { %4687 = vmatprep.subr.bf16.mxu0 %v5798_v33  ;;  %v5955_v33 = vsub.f32 %v113_v40, %v1128_v26  ;;  %v1191_v40 = vsub.f32 %v5916_v46, %v7442_v24  ;;  %v7447_v9 = vand.u32 4294901760, %v5922_v37  ;;  %v7449_v14 = vand.u32 4294901760, %v5934_v21 }
  0x9f   :  { %7639 = vst [vmem:[#allocation15_spill] sm:$0xff] %v5964_v57  ;;  %7640 = vst [vmem:[#allocation18_spill] sm:$0xff] %v5966_v13  ;;  %v5975_v41 = vpack.c.bf16 %v1185_v62, %v1178_v3  ;;  %v1304_v26 = vand.u32 4294901760, %v1303_v30  ;;  %v1198_v39 = vsub.f32 %v5918_v43, %v7445_v56  ;;  %v1134_v63 = vand.u32 4294901760, %v115_v51 }
  0xa0   :  { %4713 = vmatpush3.bf16.msra.mxu1 %v5544_v16  ;;  %v116_v16 = vld [vmem:[#allocation7 + $0x1c8] sm:$0xff]  ;;  %v5981_v12 = vpack.c.bf16 %v1083_v27, %v1080_v50  ;;  %v5983_v24 = vsub.f32 %v97_v20, %v1080_v50  ;;  %v5987_v3 = vsub.f32 %v98_v11, %v1083_v27  ;;  %v7451_v30 = vand.u32 4294901760, %v5942_v45  ;;  %v118_v27 = vld [vmem:[#allocation7 + $0x1d8] sm:$0xff] }
  0xa1   :  { %4689 = vmatpush3.bf16.msra.mxu0 %v5804_v15  ;;  %4715 = vmatprep.subr.bf16.mxu1 %v5559_v49  ;;  %v99_v15 = vld [vmem:[#allocation7 + $0x140] sm:$0xff]  ;;  %v7455_v49 = vand.u32 4294901760, %v5948_v7  ;;  %v1137_v59 = vand.u32 4294901760, %v116_v16  ;;  %v7452_v56 = vand.u32 4294901760, %v5944_v2  ;;  %v1317_v20 = vsub.f32 %v5922_v37, %v7447_v9 }
  0xa2   :  { %4691 = vmatprep.subr.bf16.mxu0 %v5868_v18  ;;  %v1311_v18 = vand.u32 4294901760, %v1310_v47  ;;  %7641 = vst [vmem:[#allocation19_spill] sm:$0xff] %v5981_v12  ;;  %v1086_v62 = vand.u32 4294901760, %v99_v15  ;;  %v117_v47 = vld [vmem:[#allocation7 + $0x1d0] sm:$0xff]  ;;  %v1199_v11 = vand.u32 4294901760, %v1198_v39  ;;  %v1089_v50 = vand.u32 4294901760, %v100_v61 }
  0xa3   :  { %v7453_v60 = vand.u32 4294901760, %v5955_v33  ;;  %v6006_v9 = vpack.c.bf16 %v1137_v59, %v1134_v63  ;;  %v6008_v42 = vsub.f32 %v115_v51, %v1134_v63  ;;  %v1205_v17 = vsub.f32 %v5942_v45, %v7451_v30 }
  0xa4   :  { %4717 = vmatpush3.bf16.msra.mxu1 %v5574_v4  ;;  %v1192_v4 = vand.u32 4294901760, %v1191_v40  ;;  %v6004_v40 = vpack.c.bf16 %v1311_v18, %v1304_v26  ;;  %v6014_v39 = vsub.f32 %v99_v15, %v1086_v62  ;;  %v1140_v26 = vand.u32 4294901760, %v117_v47  ;;  %v101_v18 = vld [vmem:[#allocation7 + $0x150] sm:$0xff] }
  0xa5   :  { %4693 = vmatpush3.bf16.msra.mxu0 %v5812_v28  ;;  %4719 = vmatprep.subr.bf16.mxu1 %v5589_v48  ;;  %v1324_v28 = vsub.f32 %v5934_v21, %v7449_v14  ;;  %v1160_v48 = vsub.f32 %v5948_v7, %v7455_v49  ;;  %v6010_v14 = vsub.f32 %v116_v16, %v1137_v59  ;;  %v1318_v59 = vand.u32 4294901760, %v1317_v20  ;;  %v6043_v49 = vld [vmem:[#allocation7 + $0x1e8] sm:$0xff] }
  0xa6   :  { %4695 = vmatprep.subr.bf16.mxu0 %v5877_v8  ;;  %v7454_v8 = vand.u32 4294901760, %v5966_v13  ;;  %7642 = vst [vmem:[#allocation20_spill] sm:$0xff] %v6014_v39  ;;  %v1143_v16 = vand.u32 4294901760, %v118_v27  ;;  %v6025_v15 = vpack.c.bf16 %v1089_v50, %v1086_v62  ;;  %v1331_v30 = vsub.f32 %v5955_v33, %v7453_v60 }
  0xa7   :  { %v1325_v51 = vand.u32 4294901760, %v1324_v28  ;;  %v1161_v63 = vand.u32 4294901760, %v1160_v48  ;;  %v6035_v20 = vsub.f32 %v100_v61, %v1089_v50  ;;  %v1092_v28 = vand.u32 4294901760, %v101_v18  ;;  %v6039_v48 = vld [vmem:[#allocation7 + $0x1e0] sm:$0xff] }
  0xa8   :  { %4721 = vmatpush3.bf16.msra.mxu1 %v5604_v23  ;;  %v1212_v23 = vsub.f32 %v5944_v2, %v7452_v56  ;;  %7643 = vst [vmem:[#allocation21_spill] sm:$0xff] %v6025_v15  ;;  %v1338_v56 = vsub.f32 %v5966_v13, %v7454_v8  ;;  %v6047_v50 = vpack.c.bf16 %v1143_v16, %v1140_v26  ;;  %v7460_v62 = vand.u32 4294901760, %v6010_v14  ;;  %v6052_v13 = vld [vmem:[#allocation7 + $0x160] sm:$0xff] }
  0xa9   :  { %4697 = vmatpush3.bf16.msra.mxu0 %v5883_v10  ;;  %4723 = vmatprep.subr.bf16.mxu1 %v7623_v5  ;;  %v102_v10 = vld [vmem:[#allocation7 + $0x158] sm:$0xff]  ;;  %v6023_v5 = vpack.c.bf16 %v1199_v11, %v1192_v4  ;;  %7644 = vst [vmem:[#allocation22_spill] sm:$0xff] %v6035_v20  ;;  %v1206_v11 = vand.u32 4294901760, %v1205_v17  ;;  %v4770_v61 = vpack.c.bf16 %v1325_v51, %v1318_v59  ;;  %v1332_v17 = vand.u32 4294901760, %v1331_v30 }
  0xaa   :  { %4731 = vmatprep.subr.bf16.mxu0 %v5890_v22  ;;  %v1213_v60 = vand.u32 4294901760, %v1212_v23  ;;  %v1095_v8 = vand.u32 4294901760, %v102_v10  ;;  %7645 = vst [vmem:[#allocation23_spill] sm:$0xff] %v6047_v50  ;;  %v6049_v4 = vsub.f32 %v117_v47, %v1140_v26  ;;  %v1339_v23 = vand.u32 4294901760, %v1338_v56 }
  0xab   :  { %v7648_v59 = vand.u32 4294901760, %v5983_v24  ;;  %v7649_v26 = vand.u32 4294901760, %v5987_v3 }
  0xac   :  { %952 = vmatmul.mubr.f32.vlgmr.msra.gmra.mrb[4].mxu0 %v5674_v29  ;;  %4725 = vmatpush3.bf16.msra.mxu1 %v7625_v55  ;;  %7646 = vst [vmem:[#allocation24_spill] sm:$0xff] %v6049_v4  ;;  %v6058_v55 = vsub.f32 %v101_v18, %v1092_v28  ;;  %v4772_v56 = vpack.c.bf16 %v1213_v60, %v1206_v11  ;;  %v6074_v18 = vld [vmem:[#allocation7 + $0x168] sm:$0xff] }
  0xad   :  { %4733 = vmatpush3.bf16.msra.mxu0 %v5892_v44  ;;  %4727 = vmatprep.subr.bf16.mxu1 %v7626_v1  ;;  %v6054_v1 = vsub.f32 %v118_v27, %v1143_v16  ;;  %v7463_v44 = vand.u32 4294901760, %v6039_v48  ;;  %v1219_v47 = vsub.f32 %v5983_v24, %v7648_v59  ;;  %v1226_v51 = vsub.f32 %v5987_v3, %v7649_v26 }
  0xae   :  { %4735 = vmatprep.subr.bf16.mxu0 %v5899_v53  ;;  %1162 = vmatprep.mubr.f32.mxu0 %v1161_v63  ;;  %v6069_v30 = vpack.c.bf16 %v1095_v8, %v1092_v28  ;;  %v1352_v59 = vsub.f32 %v6010_v14, %v7460_v62  ;;  %v6085_v28 = vld [vmem:[#allocation7 + $0x1f8] sm:$0xff]  ;;  %v6089_v16 = vsub.f32 %v102_v10, %v1095_v8  ;;  %v7652_v10 = vand.u32 4294901760, %v6052_v13 }
  0xaf   :  { %7647 = vst [vmem:[#allocation25_spill] sm:$0xff] %v6054_v1  ;;  %v6094_v63 = vsub.f32 %v6039_v48, %v7463_v44  ;;  %v1220_v60 = vand.u32 4294901760, %v1219_v47  ;;  %v1227_v26 = vand.u32 4294901760, %v1226_v51  ;;  %v6116_v47 = vld [vmem:[#allocation7 + $0x178] sm:$0xff]  ;;  %v7653_v44 = vand.u32 4294901760, %v6014_v39 }
  0xb0   :  { %4729 = vmatpush3.bf16.msra.mxu1 %v7628_v52  ;;  %v7650_v52 = vand.u32 4294901760, %v6008_v42  ;;  %v1353_v51 = vand.u32 4294901760, %v1352_v59  ;;  %v7655_v62 = vand.u32 4294901760, %v6049_v4 }
  0xb1   :  { %4737 = vmatpush3.bf16.msra.mxu0 %v5914_v0  ;;  %4763 = vmatprep.subr.bf16.mxu1 %v5962_v19  ;;  %v6083_v19 = vld [vmem:[#allocation7 + $0x1f0] sm:$0xff]  ;;  %v7660_v0 = vand.u32 4294901760, %v6089_v16 }
  0xb2   :  { %v1345_v27 = vsub.f32 %v6008_v42, %v7650_v52  ;;  %4739 = vmatprep.subr.bf16.mxu0 %v5932_v6  ;;  %v4774_v52 = vpack.c.bf16 %v1339_v23, %v1332_v17  ;;  %v7651_v6 = vand.u32 4294901760, %v6043_v49  ;;  %v1359_v17 = vsub.f32 %v6049_v4, %v7655_v62 }
  0xb3   :  { %1056 = vmatmul.mubr.f32.vlgmr.msra.gmra.mrb[4].mxu1 %v5674_v29  ;;  %v1101_v29 = vand.u32 4294901760, %v6074_v18  ;;  %v7656_v23 = vand.u32 4294901760, %v6054_v1  ;;  %v1107_v62 = vand.u32 4294901760, %v6116_v47 }
  0xb4   :  { %4765 = vmatpush3.bf16.msra.mxu1 %v5975_v41  ;;  %v6101_v11 = vsub.f32 %v6043_v49, %v7651_v6  ;;  %1398 = vmatprep.mubr.f32.mxu1 %v5920_v58  ;;  %v1346_v8 = vand.u32 4294901760, %v1345_v27  ;;  %v6110_v41 = vsub.f32 %v6052_v13, %v7652_v10  ;;  %v6114_v6 = vld [vmem:[#allocation7 + $0x170] sm:$0xff]  ;;  %v7654_v27 = vand.u32 4294901760, %v6035_v20 }
  0xb5   :  { %4741 = vmatpush3.bf16.msra.mxu0 %v5939_v34  ;;  %4767 = vmatprep.subr.bf16.mxu1 %v6004_v40  ;;  %v1233_v40 = vsub.f32 %v6014_v39, %v7653_v44  ;;  %v1366_v58 = vsub.f32 %v6054_v1, %v7656_v23  ;;  %v4776_v44 = vpack.c.bf16 %v1227_v26, %v1220_v60  ;;  %v7657_v23 = vand.u32 4294901760, %v6083_v19 }
  0xb6   :  { %4743 = vmatprep.subr.bf16.mxu0 %v5964_v57  ;;  %v1240_v10 = vsub.f32 %v6035_v20, %v7654_v27  ;;  %v6134_v57 = vand.u32 4294901760, %v5887_v25  ;;  %v6138_v27 = vsub.f32 %v6074_v18, %v1101_v29  ;;  %v1104_v20 = vand.u32 4294901760, %v6114_v6 }
  0xb7   :  { %v6146_v59 = vsub.f32 %v6083_v19, %v7657_v23  ;;  %v7658_v34 = vand.u32 4294901760, %v6085_v28  ;;  %v4778_v60 = vpack.c.bf16 %v1353_v51, %v1346_v8  ;;  %v1234_v1 = vand.u32 4294901760, %v1233_v40 }
  0xb8   :  { %4769 = vmatpush3.bf16.msra.mxu1 %v6023_v5  ;;  %v1367_v4 = vand.u32 4294901760, %v1366_v58  ;;  %v7659_v39 = vand.u32 4294901760, %v6058_v55  ;;  %v6164_v18 = vsub.f32 %v5887_v25, %v6134_v57  ;;  %v6167_v26 = vsub.f32 %v6114_v6, %v1104_v20 }
  0xb9   :  { %4745 = vmatpush3.bf16.msra.mxu0 %v5981_v12  ;;  %4771 = vmatprep.subr.bf16.mxu1 %v4770_v61  ;;  %v6151_v5 = vsub.f32 %v6085_v28, %v7658_v34  ;;  %v1241_v12 = vand.u32 4294901760, %v1240_v10  ;;  %v1360_v61 = vand.u32 4294901760, %v1359_v17  ;;  %v1254_v34 = vsub.f32 %v6089_v16, %v7660_v0 }
  0xba   :  { %4747 = vmatprep.subr.bf16.mxu0 %v6006_v9  ;;  %v1247_v23 = vsub.f32 %v6058_v55, %v7659_v39  ;;  %v6170_v8 = vsub.f32 %v6116_v47, %v1107_v62  ;;  %v7661_v0 = vand.u32 4294901760, %v6094_v63  ;;  %v7662_v25 = vand.u32 4294901760, %v6101_v11 }
  0xbb   :  { %v7663_v51 = vand.u32 4294901760, %v6039_v48  ;;  %v7664_v40 = vand.u32 4294901760, %v6043_v49  ;;  %v4782_v58 = vpack.c.bf16 %v1367_v4, %v1360_v61  ;;  %v1165_v6 = vand.u32 4294901760, %v6164_v18 }
  0xbc   :  { %4773 = vmatpush3.bf16.msra.mxu1 %v4772_v56  ;;  %v1373_v39 = vsub.f32 %v6094_v63, %v7661_v0  ;;  %v1380_v56 = vsub.f32 %v6101_v11, %v7662_v25  ;;  %v4780_v0 = vpack.c.bf16 %v1241_v12, %v1234_v1  ;;  %v1255_v25 = vand.u32 4294901760, %v1254_v34 }
  0xbd   :  { %4749 = vmatpush3.bf16.msra.mxu0 %v6025_v15  ;;  %4775 = vmatprep.subr.bf16.mxu1 %v4774_v52  ;;  %v6188_v10 = vpack.c.bf16 %v7664_v40, %v7663_v51  ;;  %v7665_v52 = vand.u32 4294901760, %v6052_v13  ;;  %v1248_v15 = vand.u32 4294901760, %v1247_v23  ;;  %v7666_v47 = vand.u32 4294901760, %v6110_v41 }
  0xbe   :  { %4751 = vmatprep.subr.bf16.mxu0 %v6047_v50  ;;  %v7667_v48 = vand.u32 4294901760, %v6138_v27  ;;  %v1274_v51 = vand.u32 4294901760, %v6167_v26  ;;  %v7486_v13 = vand.u32 4294901760, %v6170_v8  ;;  %v1374_v12 = vand.u32 4294901760, %v1373_v39 }
  0xbf   :  { %v6192_v17 = vpack.c.bf16 %v1101_v29, %v7665_v52  ;;  %v1261_v50 = vsub.f32 %v6110_v41, %v7666_v47  ;;  %v1381_v4 = vand.u32 4294901760, %v1380_v56  ;;  %v7668_v1 = vand.u32 4294901760, %v6146_v59 }
  0xc0   :  { %4777 = vmatpush3.bf16.msra.mxu1 %v4776_v44  ;;  %v1268_v49 = vsub.f32 %v6138_v27, %v7667_v48  ;;  %v7669_v44 = vand.u32 4294901760, %v6151_v5  ;;  %v7670_v23 = vand.u32 4294901760, %v6083_v19  ;;  %v7671_v34 = vand.u32 4294901760, %v6085_v28 }
  0xc1   :  { %4753 = vmatpush3.bf16.msra.mxu0 %v6069_v30  ;;  %4779 = vmatprep.subr.bf16.mxu1 %v4778_v60  ;;  %v1387_v29 = vsub.f32 %v6146_v59, %v7668_v1  ;;  %v4784_v40 = vpack.c.bf16 %v1255_v25, %v1248_v15  ;;  %v1166_v60 = vsub.f32 %v6164_v18, %v1165_v6  ;;  %v1262_v39 = vand.u32 4294901760, %v1261_v50 }
  0xc2   :  { %v1394_v61 = vsub.f32 %v6151_v5, %v7669_v44  ;;  %4755 = vmatprep.subr.bf16.mxu0 %v6188_v10  ;;  %v6215_v47 = vpack.c.bf16 %v7671_v34, %v7670_v23  ;;  %v1269_v56 = vand.u32 4294901760, %v1268_v49  ;;  %v1275_v52 = vsub.f32 %v6167_v26, %v1274_v51  ;;  %v7672_v23 = vld [vmem:[#allocation18_spill] sm:$0xff] }
  0xc3   :  { %v1282_v19 = vsub.f32 %v6170_v8, %v7486_v13  ;;  %v6227_v28 = vpack.c.bf16 %v1107_v62, %v1104_v20  ;;  %v4786_v15 = vpack.c.bf16 %v1381_v4, %v1374_v12  ;;  %v1388_v25 = vand.u32 4294901760, %v1387_v29 }
  0xc4   :  { %4781 = vmatpush3.bf16.msra.mxu1 %v4780_v0  ;;  %v1395_v48 = vand.u32 4294901760, %v1394_v61  ;;  %v4794_v50 = vpack.c.bf16 %v5854_v36, %v5852_v54  ;;  %v1167_v0 = vand.u32 4294901760, %v1166_v60  ;;  %v4788_v49 = vpack.c.bf16 %v1269_v56, %v1262_v39 }
  0xc5   :  { %4757 = vmatpush3.bf16.msra.mxu0 %v6192_v17  ;;  %4783 = vmatprep.subr.bf16.mxu1 %v4782_v58  ;;  %v1276_v1 = vand.u32 4294901760, %v1275_v52  ;;  %v1283_v44 = vand.u32 4294901760, %v1282_v19  ;;  %v4796_v20 = vpack.c.bf16 %v5861_v32, %v5859_v31  ;;  %v4798_v58 = vpack.c.bf16 %v5901_v38, %v5894_v35  ;;  %v7675_v52 = vld [vmem:[#allocation17_spill] sm:$0xff]  ;;  %v7676_v19 = vld [vmem:[#allocation14_spill] sm:$0xff] }
  0xc6   :  { %4759 = vmatprep.subr.bf16.mxu0 %v6215_v47  ;;  %v4790_v62 = vpack.c.bf16 %v1395_v48, %v1388_v25  ;;  %v4800_v4 = vpack.c.bf16 %v5918_v43, %v5916_v46  ;;  %v4802_v29 = vpack.c.bf16 %v5934_v21, %v5922_v37  ;;  %v4804_v61 = vpack.c.bf16 %v5944_v2, %v5942_v45  ;;  %v7678_v25 = vld [vmem:[#allocation22_spill] sm:$0xff] }
  0xc7   :  { %v4792_v12 = vpack.c.bf16 %v1283_v44, %v1276_v1  ;;  %v4806_v34 = vpack.c.bf16 %v7672_v23, %v5955_v33  ;;  %v7674_v60 = vand.u32 4294901760, %v5948_v7  ;;  %v4808_v39 = vpack.c.bf16 %v5987_v3, %v5983_v24  ;;  %v7682_v1 = vld [vmem:[#allocation15_spill] sm:$0xff] }
  0xc8   :  { %4785 = vmatpush3.bf16.msra.mxu1 %v4784_v40  ;;  %v7673_v40 = vld [vmem:[#allocation12_spill] sm:$0xff]  ;;  %v4810_v56 = vpack.c.bf16 %v6010_v14, %v6008_v42  ;;  %v4816_v44 = vpack.c.bf16 %v6089_v16, %v6058_v55 }
  0xc9   :  { %4761 = vmatpush3.bf16.msra.mxu0 %v6227_v28  ;;  %4787 = vmatprep.subr.bf16.mxu1 %v4786_v15  ;;  %v7677_v15 = vld [vmem:[#allocation20_spill] sm:$0xff] }
  0xca   :  { %4795 = vmatprep.subr.bf16.mxu0 %v4794_v50  ;;  %v4812_v48 = vpack.c.bf16 %v7678_v25, %v7677_v15  ;;  %v7680_v50 = vld [vmem:[#allocation25_spill] sm:$0xff] }
  0xcc   :  { %1168 = vmatmul.mubr.f32.vlgmr.msra.gmra.mrb[6].mxu0 %v1167_v0  ;;  %4789 = vmatpush3.bf16.msra.mxu1 %v4788_v49  ;;  %v7681_v49 = vld [vmem:[#allocation16_spill] sm:$0xff] }
  0xcd   :  { %4797 = vmatpush3.bf16.msra.mxu0 %v4796_v20  ;;  %4791 = vmatprep.subr.bf16.mxu1 %v4790_v62  ;;  %v4818_v20 = vpack.c.bf16 %v6101_v11, %v6094_v63  ;;  %v7683_v62 = vld [vmem:[#allocation19_spill] sm:$0xff] }
  0xce   :  { %4799 = vmatprep.subr.bf16.mxu0 %v4798_v58  ;;  %1535 = vmatprep.mubr.f32.mxu0 %v5948_v7  ;;  %v7679_v7 = vld [vmem:[#allocation24_spill] sm:$0xff]  ;;  %v4820_v58 = vpack.c.bf16 %v6138_v27, %v6110_v41 }
  0xcf   :  { %v4814_v0 = vpack.c.bf16 %v7680_v50, %v7679_v7 }
  0xd0   :  { %4793 = vmatpush3.bf16.msra.mxu1 %v4792_v12  ;;  %v4822_v12 = vpack.c.bf16 %v6151_v5, %v6146_v59 }
  0xd1   :  { %4801 = vmatpush3.bf16.msra.mxu0 %v4800_v4  ;;  %4827 = vmatprep.subr.bf16.mxu1 %v5890_v22  ;;  %v7684_v4 = vld [vmem:[#allocation21_spill] sm:$0xff] }
  0xd2   :  { %4803 = vmatprep.subr.bf16.mxu0 %v4802_v29  ;;  %v7685_v29 = vld [vmem:[#allocation23_spill] sm:$0xff] }
  0xd3   :  { %1400 = vmatmul.mubr.f32.vlgmr.msra.gmra.mrb[6].mxu1 %v6134_v57 }
  0xd4   :  { %4829 = vmatpush3.bf16.msra.mxu1 %v7673_v40  ;;  %1642 = vmatprep.mubr.f32.mxu1 %v7674_v60  ;;  %v7687_v60 = vand.u32 4294901760, %v5854_v36  ;;  %v140_v36 = vld [vmem:[#allocation7 + $0x288] sm:$0xff] }
  0xd5   :  { %4805 = vmatpush3.bf16.msra.mxu0 %v4804_v61  ;;  %4831 = vmatprep.subr.bf16.mxu1 %v5899_v53  ;;  %v4824_v61 = vpack.c.bf16 %v6170_v8, %v6167_v26 }
  0xd6   :  { %4807 = vmatprep.subr.bf16.mxu0 %v4806_v34  ;;  %v7686_v34 = vand.u32 4294901760, %v5852_v54  ;;  %v6292_v54 = vld [vmem:[#allocation7 + $0x280] sm:$0xff] }
  0xd8   :  { %4833 = vmatpush3.bf16.msra.mxu1 %v7675_v52 }
  0xd9   :  { %4809 = vmatpush3.bf16.msra.mxu0 %v4808_v39  ;;  %4835 = vmatprep.subr.bf16.mxu1 %v7676_v19  ;;  %v4858_v39 = vpack.c.bf16 %v7687_v60, %v7686_v34  ;;  %v7694_v34 = vand.u32 4294901760, %v5922_v37  ;;  %v7695_v60 = vand.u32 4294901760, %v5934_v21  ;;  %v7699_v21 = vand.u32 4294901760, %v5955_v33 }
  0xda   :  { %4811 = vmatprep.subr.bf16.mxu0 %v4810_v56  ;;  %v7688_v56 = vand.u32 4294901760, %v5859_v31  ;;  %v7692_v31 = vand.u32 4294901760, %v5916_v46  ;;  %v142_v46 = vld [vmem:[#allocation7 + $0x298] sm:$0xff]  ;;  %v7706_v33 = vand.u32 4294901760, %v7678_v25  ;;  %v7708_v25 = vand.u32 4294901760, %v7680_v50 }
  0xdc   :  { %4837 = vmatpush3.bf16.msra.mxu1 %v7681_v49 }
  0xdd   :  { %4813 = vmatpush3.bf16.msra.mxu0 %v4812_v48  ;;  %4839 = vmatprep.subr.bf16.mxu1 %v7682_v1  ;;  %v7689_v48 = vand.u32 4294901760, %v5861_v32  ;;  %v7693_v32 = vand.u32 4294901760, %v5918_v43  ;;  %v7697_v43 = vand.u32 4294901760, %v5942_v45  ;;  %v7704_v45 = vand.u32 4294901760, %v6010_v14  ;;  %v6340_v14 = vld [vmem:[#allocation2 + $0x10] sm:$0xff] }
  0xde   :  { %4815 = vmatprep.subr.bf16.mxu0 %v4814_v0 }
  0xdf   :  { %v4860_v0 = vpack.c.bf16 %v7689_v48, %v7688_v56  ;;  %v7696_v56 = vld [vmem:[#allocation13_spill] sm:$0xff]  ;;  %v1975_v48 = vand.u32 4294901760, %v140_v36 }
  0xe0   :  { %4841 = vmatpush3.bf16.msra.mxu1 %v7683_v62 }
  0xe1   :  { %4817 = vmatpush3.bf16.msra.mxu0 %v4816_v44  ;;  %4843 = vmatprep.subr.bf16.mxu1 %v6006_v9  ;;  %v7690_v44 = vand.u32 4294901760, %v5894_v35  ;;  %v4864_v35 = vpack.c.bf16 %v7693_v32, %v7692_v31  ;;  %v7700_v31 = vand.u32 4294901760, %v7672_v23 }
  0xe2   :  { %4819 = vmatprep.subr.bf16.mxu0 %v4818_v20  ;;  %v7691_v20 = vand.u32 4294901760, %v5901_v38  ;;  %v1972_v38 = vand.u32 4294901760, %v6292_v54 }
  0xe3   :  { %v4870_v32 = vpack.c.bf16 %v7700_v31, %v7699_v21  ;;  %v126_v21 = vld [vmem:[#allocation7 + $0x218] sm:$0xff]  ;;  %v7709_v31 = vand.u32 4294901760, %v6058_v55 }
  0xe4   :  { %4845 = vmatpush3.bf16.msra.mxu1 %v7684_v4  ;;  %v1933_v50 = vand.u32 4294901760, %v126_v21 }
  0xe5   :  { %4821 = vmatpush3.bf16.msra.mxu0 %v4820_v58  ;;  %4847 = vmatprep.subr.bf16.mxu1 %v7685_v29  ;;  %v4862_v58 = vpack.c.bf16 %v7691_v20, %v7690_v44  ;;  %v141_v20 = vld [vmem:[#allocation7 + $0x290] sm:$0xff] }
  0xe6   :  { %4823 = vmatprep.subr.bf16.mxu0 %v4822_v12  ;;  %v123_v12 = vld [vmem:[#allocation7 + $0x200] sm:$0xff] }
  0xe7   :  { %v1924_v44 = vand.u32 4294901760, %v123_v12 }
  0xe8   :  { %4849 = vmatpush3.bf16.msra.mxu1 %v6069_v30 }
  0xe9   :  { %4825 = vmatpush3.bf16.msra.mxu0 %v4824_v61  ;;  %4851 = vmatprep.subr.bf16.mxu1 %v6188_v10  ;;  %v124_v61 = vld [vmem:[#allocation7 + $0x208] sm:$0xff] }
  0xea   :  { %4859 = vmatprep.subr.bf16.mxu0 %v4858_v39  ;;  %v4866_v39 = vpack.c.bf16 %v7695_v60, %v7694_v34  ;;  %v6318_v34 = vsub.f32 %v6292_v54, %v1972_v38  ;;  %v7701_v60 = vand.u32 4294901760, %v5983_v24  ;;  %v125_v54 = vld [vmem:[#allocation7 + $0x210] sm:$0xff]  ;;  %v6336_v24 = vsub.f32 %v123_v12, %v1924_v44 }
  0xeb   :  { %v7711_v12 = vand.u32 4294901760, %v6094_v63 }
  0xec   :  { %1538 = vmatmul.mubr.f32.vlgmr.msra.gmra.mrb[8].mxu0 %v6164_v18  ;;  %4853 = vmatpush3.bf16.msra.mxu1 %v6192_v17  ;;  %v7710_v18 = vand.u32 4294901760, %v6089_v16  ;;  %v1930_v16 = vand.u32 4294901760, %v125_v54  ;;  %v7494_v63 = vand.u32 4294901760, %v6318_v34 }
  0xed   :  { %4861 = vmatpush3.bf16.msra.mxu0 %v4860_v0  ;;  %4855 = vmatprep.subr.bf16.mxu1 %v6215_v47  ;;  %v1927_v0 = vand.u32 4294901760, %v124_v61 }
  0xee   :  { %4863 = vmatprep.subr.bf16.mxu0 %v4862_v58  ;;  %1812 = vmatprep.mubr.f32.mxu0 %v7696_v56  ;;  %v7698_v58 = vand.u32 4294901760, %v5944_v2 }
  0xf0   :  { %4857 = vmatpush3.bf16.msra.mxu1 %v6227_v28  ;;  %v4868_v37 = vpack.c.bf16 %v7698_v58, %v7697_v43  ;;  %v7705_v43 = vand.u32 4294901760, %v7677_v15  ;;  %v6332_v58 = vsub.f32 %v140_v36, %v1975_v48  ;;  %v7707_v15 = vand.u32 4294901760, %v7679_v7 }
  0xf1   :  { %4865 = vmatpush3.bf16.msra.mxu0 %v4864_v35  ;;  %4891 = vmatprep.subr.bf16.mxu1 %v5890_v22  ;;  %v7702_v35 = vand.u32 4294901760, %v5987_v3  ;;  %v7703_v22 = vand.u32 4294901760, %v6008_v42  ;;  %v6338_v3 = vsub.f32 %v124_v61, %v1927_v0  ;;  %v1978_v42 = vand.u32 4294901760, %v141_v20 }
  0xf2   :  { %4867 = vmatprep.subr.bf16.mxu0 %v4866_v39  ;;  %v4876_v23 = vpack.c.bf16 %v7706_v33, %v7705_v43  ;;  %v1981_v39 = vand.u32 4294901760, %v142_v46  ;;  %v4878_v36 = vpack.c.bf16 %v7708_v25, %v7707_v15  ;;  %v7712_v61 = vand.u32 4294901760, %v6101_v11 }
  0xf3   :  { %v4872_v13 = vpack.c.bf16 %v7702_v35, %v7701_v60  ;;  %v4874_v2 = vpack.c.bf16 %v7704_v45, %v7703_v22  ;;  %1646 = vmatmul.mubr.f32.vlgmr.msra.gmra.mrb[8].mxu1 %v1165_v6  ;;  %v6351_v6 = vpack.c.bf16 %v7710_v18, %v7709_v31  ;;  %v7714_v7 = vand.u32 4294901760, %v6138_v27  ;;  %v143_v35 = vld [vmem:[#allocation7 + $0x2a0] sm:$0xff]  ;;  %v144_v27 = vld [vmem:[#allocation7 + $0x2a8] sm:$0xff] }
  0xf4   :  { %4893 = vmatpush3.bf16.msra.mxu1 %v7673_v40  ;;  %v6357_v60 = vpack.c.bf16 %v7712_v61, %v7711_v12  ;;  %1916 = vmatprep.mubr.f32.mxu1 %v7696_v56  ;;  %v7713_v40 = vand.u32 4294901760, %v6110_v41  ;;  %v7715_v11 = vand.u32 4294901760, %v6146_v59  ;;  %v7716_v22 = vand.u32 4294901760, %v6151_v5  ;;  %v127_v59 = vld [vmem:[#allocation7 + $0x220] sm:$0xff]  ;;  %v128_v5 = vld [vmem:[#allocation7 + $0x228] sm:$0xff] }
  0xf5   :  { %4869 = vmatpush3.bf16.msra.mxu0 %v4868_v37  ;;  %4895 = vmatprep.subr.bf16.mxu1 %v5899_v53  ;;  %v7717_v53 = vand.u32 4294901760, %v6170_v8  ;;  %v7493_v37 = vand.u32 4294901760, %v6332_v58  ;;  %v193_v45 = vcombine.high %v6340_v14, %v6340_v14  ;;  %v6383_v43 = vsub.f32 %v141_v20, %v1978_v42 }
  0xf6   :  { %v6365_v55 = vpack.c.bf16 %v7714_v7, %v7713_v40  ;;  %4871 = vmatprep.subr.bf16.mxu0 %v4870_v32  ;;  %v6372_v56 = vpack.c.bf16 %v7716_v22, %v7715_v11  ;;  %v6385_v32 = vsub.f32 %v142_v46, %v1981_v39  ;;  %v7492_v33 = vand.u32 4294901760, %v6336_v24  ;;  %v129_v11 = vld [vmem:[#allocation7 + $0x230] sm:$0xff] }
  0xf7   :  { %v6378_v41 = vpack.c.bf16 %v7717_v53, %v1274_v51  ;;  %v7487_v26 = vand.u32 4294901760, %v6338_v3  ;;  %v6390_v8 = vpack.c.bf16 %v1975_v48, %v1972_v38  ;;  %v6392_v51 = vpack.c.bf16 %v1927_v0, %v1924_v44  ;;  %v146_v38 = vld [vmem:[#allocation7 + $0x2b8] sm:$0xff] }
  0xf8   :  { %4897 = vmatpush3.bf16.msra.mxu1 %v7675_v52  ;;  %v6394_v15 = vpack.c.bf16 %v1981_v39, %v1978_v42  ;;  %v1984_v25 = vand.u32 4294901760, %v143_v35  ;;  %v6397_v20 = vsub.f32 %v125_v54, %v1930_v16  ;;  %v6399_v46 = vsub.f32 %v126_v21, %v1933_v50  ;;  %v145_v52 = vld [vmem:[#allocation7 + $0x2b0] sm:$0xff] }
  0xf9   :  { %7718 = vst [vmem:[#allocation18_spill] sm:$0xff] %v6392_v51  ;;  %4873 = vmatpush3.bf16.msra.mxu0 %v4872_v13  ;;  %4899 = vmatprep.subr.bf16.mxu1 %v7676_v19  ;;  %v1987_v31 = vand.u32 4294901760, %v144_v27  ;;  %v2151_v18 = vsub.f32 %v6318_v34, %v7494_v63  ;;  %v2158_v48 = vsub.f32 %v6332_v58, %v7493_v37  ;;  %v1936_v44 = vand.u32 4294901760, %v127_v59  ;;  %v131_v63 = vld [vmem:[#allocation7 + $0x240] sm:$0xff] }
  0xfa   :  { %4875 = vmatprep.subr.bf16.mxu0 %v4874_v2  ;;  %v1939_v13 = vand.u32 4294901760, %v128_v5  ;;  %v6407_v0 = vand.u32 4294901760, %v193_v45  ;;  %v2039_v19 = vsub.f32 %v6336_v24, %v7492_v33  ;;  %v2046_v54 = vsub.f32 %v6338_v3, %v7487_v26 }
  0xfb   :  { %v7490_v21 = vand.u32 4294901760, %v6383_v43  ;;  %v7488_v2 = vand.u32 4294901760, %v6385_v32  ;;  %v6418_v42 = vpack.c.bf16 %v1933_v50, %v1930_v16  ;;  %v6420_v39 = vsub.f32 %v143_v35, %v1984_v25  ;;  %v130_v35 = vld [vmem:[#allocation7 + $0x238] sm:$0xff] }
  0xfc   :  { %7719 = vst [vmem:[#allocation12_spill] sm:$0xff] %v6407_v0  ;;  %4901 = vmatpush3.bf16.msra.mxu1 %v7681_v49  ;;  %v1990_v12 = vand.u32 4294901760, %v145_v52  ;;  %v1993_v61 = vand.u32 4294901760, %v146_v38  ;;  %v6423_v40 = vpack.c.bf16 %v1987_v31, %v1984_v25  ;;  %v6425_v7 = vsub.f32 %v144_v27, %v1987_v31 }
  0xfd   :  { %7720 = vst [vmem:[#allocation17_spill] sm:$0xff] %v6418_v42  ;;  %4877 = vmatpush3.bf16.msra.mxu0 %v4876_v23  ;;  %4903 = vmatprep.subr.bf16.mxu1 %v7682_v1  ;;  %v7489_v22 = vand.u32 4294901760, %v6397_v20  ;;  %v7491_v53 = vand.u32 4294901760, %v6399_v46  ;;  %v2152_v49 = vand.u32 4294901760, %v2151_v18  ;;  %v2159_v16 = vand.u32 4294901760, %v2158_v48 }
  0xfe   :  { %7721 = vst [vmem:[#allocation14_spill] sm:$0xff] %v6423_v40  ;;  %4879 = vmatprep.subr.bf16.mxu0 %v4878_v36  ;;  %v6429_v50 = vpack.c.bf16 %v1939_v13, %v1936_v44  ;;  %v6432_v26 = vsub.f32 %v193_v45, %v6407_v0  ;;  %v2040_v23 = vand.u32 4294901760, %v2039_v19  ;;  %v2047_v1 = vand.u32 4294901760, %v2046_v54 }
  0xff   :  { %v2165_v27 = vsub.f32 %v6383_v43, %v7490_v21  ;;  %v2172_v25 = vsub.f32 %v6385_v32, %v7488_v2  ;;  %v6441_v36 = vsub.f32 %v127_v59, %v1936_v44  ;;  %v6443_v31 = vsub.f32 %v128_v5, %v1939_v13  ;;  %v147_v59 = vld [vmem:[#allocation7 + $0x2c0] sm:$0xff]  ;;  %v148_v44 = vld [vmem:[#allocation7 + $0x2c8] sm:$0xff] }
 0x100   :  { %7722 = vst [vmem:[#allocation20_spill] sm:$0xff] %v6429_v50  ;;  %4905 = vmatpush3.bf16.msra.mxu1 %v7683_v62  ;;  %v6445_v18 = vpack.c.bf16 %v1993_v61, %v1990_v12  ;;  %v1942_v45 = vand.u32 4294901760, %v129_v11  ;;  %v1945_v48 = vand.u32 4294901760, %v130_v35  ;;  %v2053_v19 = vsub.f32 %v6397_v20, %v7489_v22 }
 0x101   :  { %7723 = vst [vmem:[#allocation22_spill] sm:$0xff] %v6441_v36  ;;  %4881 = vmatpush3.bf16.msra.mxu0 %v6351_v6  ;;  %4907 = vmatprep.subr.bf16.mxu1 %v6006_v9  ;;  %v2060_v62 = vsub.f32 %v6399_v46, %v7491_v53  ;;  %v7496_v5 = vand.u32 4294901760, %v6420_v39  ;;  %v6457_v13 = vsub.f32 %v145_v52, %v1990_v12  ;;  %v7495_v9 = vand.u32 4294901760, %v6425_v7 }
 0x102   :  { %7724 = vst [vmem:[#allocation24_spill] sm:$0xff] %v6445_v18  ;;  %4883 = vmatprep.subr.bf16.mxu0 %v6357_v60  ;;  %v6459_v6 = vsub.f32 %v146_v38, %v1993_v61  ;;  %v7497_v54 = vand.u32 4294901760, %v6432_v26  ;;  %v6463_v2 = vpack.c.bf16 %v2159_v16, %v2152_v49  ;;  %v6465_v22 = vpack.c.bf16 %v2047_v1, %v2040_v23  ;;  %v132_v60 = vld [vmem:[#allocation7 + $0x248] sm:$0xff] }
 0x103   :  { %v2166_v21 = vand.u32 4294901760, %v2165_v27  ;;  %v2173_v53 = vand.u32 4294901760, %v2172_v25  ;;  %v1996_v33 = vand.u32 4294901760, %v147_v59  ;;  %v1999_v37 = vand.u32 4294901760, %v148_v44  ;;  %v149_v25 = vld [vmem:[#allocation7 + $0x2d0] sm:$0xff] }
 0x104   :  { %4909 = vmatpush3.bf16.msra.mxu1 %v7684_v4  ;;  %v7498_v52 = vand.u32 4294901760, %v6441_v36  ;;  %v7501_v38 = vand.u32 4294901760, %v6443_v31  ;;  %v6472_v12 = vpack.c.bf16 %v1945_v48, %v1942_v45  ;;  %v2054_v61 = vand.u32 4294901760, %v2053_v19  ;;  %v150_v19 = vld [vmem:[#allocation7 + $0x2d8] sm:$0xff] }
 0x105   :  { %4885 = vmatpush3.bf16.msra.mxu0 %v6365_v55  ;;  %4911 = vmatprep.subr.bf16.mxu1 %v7685_v29  ;;  %v2061_v49 = vand.u32 4294901760, %v2060_v62  ;;  %v2179_v4 = vsub.f32 %v6420_v39, %v7496_v5  ;;  %v6478_v16 = vsub.f32 %v129_v11, %v1942_v45  ;;  %v6480_v23 = vsub.f32 %v130_v35, %v1945_v48  ;;  %v134_v62 = vld [vmem:[#allocation7 + $0x258] sm:$0xff] }
 0x106   :  { %7725 = vst [vmem:[#allocation25_spill] sm:$0xff] %v6472_v12  ;;  %4887 = vmatprep.subr.bf16.mxu0 %v6372_v56  ;;  %v2186_v55 = vsub.f32 %v6425_v7, %v7495_v9  ;;  %v2022_v29 = vsub.f32 %v6432_v26, %v7497_v54  ;;  %v1948_v1 = vand.u32 4294901760, %v131_v63  ;;  %v1951_v27 = vand.u32 4294901760, %v132_v60  ;;  %v133_v56 = vld [vmem:[#allocation7 + $0x250] sm:$0xff] }
 0x107   :  { %v6491_v11 = vpack.c.bf16 %v2173_v53, %v2166_v21  ;;  %v6493_v35 = vpack.c.bf16 %v1999_v37, %v1996_v33  ;;  %v2067_v45 = vsub.f32 %v6441_v36, %v7498_v52  ;;  %v2074_v48 = vsub.f32 %v6443_v31, %v7501_v38 }
 0x108   :  { %4913 = vmatpush3.bf16.msra.mxu1 %v6069_v30  ;;  %v6503_v9 = vpack.c.bf16 %v2061_v49, %v2054_v61  ;;  %v6505_v5 = vsub.f32 %v147_v59, %v1996_v33  ;;  %v6507_v30 = vsub.f32 %v148_v44, %v1999_v37  ;;  %v2180_v21 = vand.u32 4294901760, %v2179_v4  ;;  %v6539_v49 = vld [vmem:[#allocation7 + $0x260] sm:$0xff] }
 0x109   :  { %4889 = vmatpush3.bf16.msra.mxu0 %v6378_v41  ;;  %4915 = vmatprep.subr.bf16.mxu1 %v6188_v10  ;;  %v2187_v53 = vand.u32 4294901760, %v2186_v55  ;;  %v2002_v54 = vand.u32 4294901760, %v149_v25  ;;  %v2005_v52 = vand.u32 4294901760, %v150_v19  ;;  %v2023_v36 = vand.u32 4294901760, %v2022_v29 }
 0x10a   :  { %4923 = vmatprep.subr.bf16.mxu0 %v6390_v8  ;;  %v6510_v38 = vpack.c.bf16 %v1951_v27, %v1948_v1  ;;  %v6512_v41 = vsub.f32 %v131_v63, %v1948_v1  ;;  %v7728_v10 = vand.u32 4294901760, %v6457_v13  ;;  %v7729_v37 = vand.u32 4294901760, %v6459_v6  ;;  %v6524_v63 = vld [vmem:[#allocation7 + $0x2e0] sm:$0xff] }
 0x10b   :  { %v2068_v44 = vand.u32 4294901760, %v2067_v45  ;;  %v2075_v61 = vand.u32 4294901760, %v2074_v48  ;;  %v6528_v55 = vsub.f32 %v132_v60, %v1951_v27  ;;  %v1954_v29 = vand.u32 4294901760, %v133_v56 }
 0x10c   :  { %7726 = vst [vmem:[#allocation16_spill] sm:$0xff] %v6510_v38  ;;  %7727 = vst [vmem:[#allocation15_spill] sm:$0xff] %v6512_v41  ;;  %v2193_v33 = vsub.f32 %v6457_v13, %v7728_v10  ;;  %v2200_v59 = vsub.f32 %v6459_v6, %v7729_v37  ;;  %1814 = vmatmul.mubr.f32.vlgmr.msra.gmra.mrb[10].mxu0 %v6134_v57  ;;  %4917 = vmatpush3.bf16.msra.mxu1 %v6192_v17  ;;  %v1957_v1 = vand.u32 4294901760, %v134_v62  ;;  %v6530_v10 = vld [vmem:[#allocation7 + $0x2e8] sm:$0xff] }
 0x10d   :  { %4925 = vmatpush3.bf16.msra.mxu0 %v6392_v51  ;;  %4919 = vmatprep.subr.bf16.mxu1 %v6215_v47  ;;  %7730 = vst [vmem:[#allocation19_spill] sm:$0xff] %v6528_v55  ;;  %v4962_v45 = vpack.c.bf16 %v2187_v53, %v2180_v21  ;;  %v6534_v48 = vpack.c.bf16 %v2005_v52, %v2002_v54  ;;  %v7504_v4 = vand.u32 4294901760, %v6507_v30  ;;  %v7507_v51 = vand.u32 4294901760, %v6524_v63 }
 0x10e   :  { %4927 = vmatprep.subr.bf16.mxu0 %v6394_v15  ;;  %v6536_v37 = vsub.f32 %v149_v25, %v2002_v54  ;;  %2024 = vmatprep.mubr.f32.mxu0 %v2023_v36  ;;  %v6541_v47 = vsub.f32 %v150_v19, %v2005_v52  ;;  %v2194_v60 = vand.u32 4294901760, %v2193_v33  ;;  %v2201_v27 = vand.u32 4294901760, %v2200_v59  ;;  %v6563_v59 = vld [vmem:[#allocation7 + $0x268] sm:$0xff] }
 0x10f   :  { %7731 = vst [vmem:[#allocation21_spill] sm:$0xff] %v6534_v48  ;;  %v6545_v17 = vpack.c.bf16 %v2075_v61, %v2068_v44  ;;  %v7734_v21 = vand.u32 4294901760, %v6478_v16  ;;  %v7735_v25 = vand.u32 4294901760, %v6480_v23  ;;  %v6556_v52 = vpack.c.bf16 %v1957_v1, %v1954_v29 }
 0x110   :  { %7732 = vst [vmem:[#allocation23_spill] sm:$0xff] %v6536_v37  ;;  %7733 = vst [vmem:[#allocation13_spill] sm:$0xff] %v6541_v47  ;;  %4921 = vmatpush3.bf16.msra.mxu1 %v6227_v28  ;;  %v6558_v19 = vsub.f32 %v133_v56, %v1954_v29  ;;  %v7736_v28 = vand.u32 4294901760, %v6505_v5  ;;  %v2214_v61 = vsub.f32 %v6507_v30, %v7504_v4  ;;  %v6572_v56 = vld [vmem:[#allocation7 + $0x2f0] sm:$0xff]  ;;  %v6574_v29 = vld [vmem:[#allocation7 + $0x2f8] sm:$0xff]  ;;  %v7741_v4 = vand.u32 4294901760, %v6536_v37 }
 0x111   :  { %v2081_v54 = vsub.f32 %v6478_v16, %v7734_v21  ;;  %v2088_v53 = vsub.f32 %v6480_v23, %v7735_v25  ;;  %4929 = vmatpush3.bf16.msra.mxu0 %v6418_v42  ;;  %4955 = vmatprep.subr.bf16.mxu1 %v6463_v2  ;;  %v6578_v44 = vsub.f32 %v134_v62, %v1957_v1  ;;  %v7738_v1 = vand.u32 4294901760, %v6539_v49 }
 0x112   :  { %v2207_v33 = vsub.f32 %v6505_v5, %v7736_v28  ;;  %4931 = vmatprep.subr.bf16.mxu0 %v6423_v40  ;;  %v4966_v28 = vpack.c.bf16 %v2201_v27, %v2194_v60  ;;  %v6583_v36 = vsub.f32 %v6524_v63, %v7507_v51  ;;  %v7737_v40 = vand.u32 4294901760, %v6530_v10 }
 0x113   :  { %1918 = vmatmul.mubr.f32.vlgmr.msra.gmra.mrb[10].mxu1 %v6134_v57  ;;  %v2082_v21 = vand.u32 4294901760, %v2081_v54  ;;  %v2089_v2 = vand.u32 4294901760, %v2088_v53  ;;  %v1963_v57 = vand.u32 4294901760, %v6563_v59  ;;  %v6605_v54 = vld [vmem:[#allocation7 + $0x278] sm:$0xff]  ;;  %v2215_v53 = vand.u32 4294901760, %v2214_v61 }
 0x114   :  { %4957 = vmatpush3.bf16.msra.mxu1 %v6465_v22  ;;  %v6590_v25 = vsub.f32 %v6530_v10, %v7737_v40  ;;  %2260 = vmatprep.mubr.f32.mxu1 %v6407_v0  ;;  %v2208_v62 = vand.u32 4294901760, %v2207_v33  ;;  %v6599_v22 = vsub.f32 %v6539_v49, %v7738_v1  ;;  %v6603_v40 = vld [vmem:[#allocation7 + $0x270] sm:$0xff]  ;;  %v7739_v51 = vand.u32 4294901760, %v6512_v41 }
 0x115   :  { %4933 = vmatpush3.bf16.msra.mxu0 %v6429_v50  ;;  %4959 = vmatprep.subr.bf16.mxu1 %v6491_v11  ;;  %v7740_v33 = vand.u32 4294901760, %v6528_v55  ;;  %v2221_v60 = vsub.f32 %v6536_v37, %v7741_v4  ;;  %v7742_v27 = vand.u32 4294901760, %v6541_v47  ;;  %v1969_v4 = vand.u32 4294901760, %v6605_v54 }
 0x116   :  { %4935 = vmatprep.subr.bf16.mxu0 %v6445_v18  ;;  %v2095_v11 = vsub.f32 %v6512_v41, %v7739_v51  ;;  %v6623_v18 = vand.u32 4294901760, %v6340_v14  ;;  %v4968_v51 = vpack.c.bf16 %v2089_v2, %v2082_v21  ;;  %v7745_v50 = vand.u32 4294901760, %v6574_v29 }
 0x117   :  { %v2102_v1 = vsub.f32 %v6528_v55, %v7740_v33  ;;  %v2228_v0 = vsub.f32 %v6541_v47, %v7742_v27  ;;  %v6627_v33 = vsub.f32 %v6563_v59, %v1963_v57  ;;  %v1966_v55 = vand.u32 4294901760, %v6603_v40 }
 0x118   :  { %7743 = vst [vmem:[#allocation26_spill] sm:$0xff] %v6623_v18  ;;  %4961 = vmatpush3.bf16.msra.mxu1 %v6503_v9  ;;  %v7744_v27 = vand.u32 4294901760, %v6572_v56  ;;  %v6640_v9 = vsub.f32 %v6574_v29, %v7745_v50  ;;  %v7528_v2 = vand.u32 4294901760, %v6590_v25  ;;  %v4970_v21 = vpack.c.bf16 %v2215_v53, %v2208_v62 }
 0x119   :  { %4937 = vmatpush3.bf16.msra.mxu0 %v6472_v12  ;;  %4963 = vmatprep.subr.bf16.mxu1 %v4962_v45  ;;  %v2096_v47 = vand.u32 4294901760, %v2095_v11  ;;  %v2103_v12 = vand.u32 4294901760, %v2102_v1  ;;  %v2222_v45 = vand.u32 4294901760, %v2221_v60  ;;  %v2229_v37 = vand.u32 4294901760, %v2228_v0 }
 0x11a   :  { %v6635_v61 = vsub.f32 %v6572_v56, %v7744_v27  ;;  %4939 = vmatprep.subr.bf16.mxu0 %v6493_v35  ;;  %v7746_v41 = vand.u32 4294901760, %v6558_v19  ;;  %v7747_v42 = vand.u32 4294901760, %v6578_v44  ;;  %v6653_v59 = vsub.f32 %v6340_v14, %v6623_v18 }
 0x11b   :  { %v6657_v62 = vsub.f32 %v6603_v40, %v1966_v55  ;;  %v6660_v60 = vsub.f32 %v6605_v54, %v1969_v4  ;;  %v7749_v53 = vand.u32 4294901760, %v6524_v63  ;;  %v7750_v11 = vand.u32 4294901760, %v6530_v10 }
 0x11c   :  { %v2109_v27 = vsub.f32 %v6558_v19, %v7746_v41  ;;  %v2116_v50 = vsub.f32 %v6578_v44, %v7747_v42  ;;  %4965 = vmatpush3.bf16.msra.mxu1 %v6545_v17  ;;  %v7748_v42 = vand.u32 4294901760, %v6583_v36  ;;  %v2242_v17 = vsub.f32 %v6590_v25, %v7528_v2 }
 0x11d   :  { %4941 = vmatpush3.bf16.msra.mxu0 %v6510_v38  ;;  %4967 = vmatprep.subr.bf16.mxu1 %v4966_v28  ;;  %v6678_v1 = vpack.c.bf16 %v7750_v11, %v7749_v53  ;;  %v7752_v28 = vand.u32 4294901760, %v6539_v49  ;;  %v4974_v0 = vpack.c.bf16 %v2229_v37, %v2222_v45  ;;  %v7533_v40 = vand.u32 4294901760, %v6653_v59 }
 0x11e   :  { %v2235_v14 = vsub.f32 %v6583_v36, %v7748_v42  ;;  %4943 = vmatprep.subr.bf16.mxu0 %v6534_v48  ;;  %v4972_v42 = vpack.c.bf16 %v2103_v12, %v2096_v47  ;;  %v2110_v38 = vand.u32 4294901760, %v2109_v27  ;;  %v2117_v2 = vand.u32 4294901760, %v2116_v50 }
 0x11f   :  { %7751 = vst [vmem:[#allocation27_spill] sm:$0xff] %v6678_v1  ;;  %v6682_v41 = vpack.c.bf16 %v1963_v57, %v7752_v28  ;;  %v7753_v54 = vand.u32 4294901760, %v6599_v22  ;;  %v7754_v63 = vand.u32 4294901760, %v6627_v33  ;;  %v7532_v53 = vand.u32 4294901760, %v6657_v62 }
 0x120   :  { %4969 = vmatpush3.bf16.msra.mxu1 %v4968_v51  ;;  %v7531_v49 = vand.u32 4294901760, %v6660_v60  ;;  %v2236_v12 = vand.u32 4294901760, %v2235_v14  ;;  %v2243_v37 = vand.u32 4294901760, %v2242_v17  ;;  %v7755_v47 = vand.u32 4294901760, %v6635_v61 }
 0x121   :  { %v2123_v48 = vsub.f32 %v6599_v22, %v7753_v54  ;;  %v2130_v10 = vsub.f32 %v6627_v33, %v7754_v63  ;;  %4945 = vmatpush3.bf16.msra.mxu0 %v6556_v52  ;;  %4971 = vmatprep.subr.bf16.mxu1 %v4970_v21  ;;  %v7756_v51 = vand.u32 4294901760, %v6640_v9  ;;  %v7757_v27 = vand.u32 4294901760, %v6572_v56 }
 0x122   :  { %v2249_v57 = vsub.f32 %v6635_v61, %v7755_v47  ;;  %4947 = vmatprep.subr.bf16.mxu0 %v6678_v1  ;;  %v7758_v50 = vand.u32 4294901760, %v6574_v29  ;;  %v4976_v11 = vpack.c.bf16 %v2117_v2, %v2110_v38  ;;  %v2028_v21 = vsub.f32 %v6653_v59, %v7533_v40 }
 0x123   :  { %v2256_v45 = vsub.f32 %v6640_v9, %v7756_v51  ;;  %v2124_v14 = vand.u32 4294901760, %v2123_v48  ;;  %v2131_v17 = vand.u32 4294901760, %v2130_v10  ;;  %v2137_v28 = vsub.f32 %v6657_v62, %v7532_v53  ;;  %v6779_v53 = vld [vmem:[#allocation7 + $0x308] sm:$0xff] }
 0x124   :  { %v6705_v54 = vpack.c.bf16 %v7758_v50, %v7757_v27  ;;  %4973 = vmatpush3.bf16.msra.mxu1 %v4972_v42  ;;  %v2144_v56 = vsub.f32 %v6660_v60, %v7531_v49  ;;  %v6717_v29 = vpack.c.bf16 %v1969_v4, %v1966_v55  ;;  %v4978_v38 = vpack.c.bf16 %v2243_v37, %v2236_v12 }
 0x125   :  { %4949 = vmatpush3.bf16.msra.mxu0 %v6682_v41  ;;  %4975 = vmatprep.subr.bf16.mxu1 %v4974_v0  ;;  %v2250_v2 = vand.u32 4294901760, %v2249_v57  ;;  %v2257_v63 = vand.u32 4294901760, %v2256_v45  ;;  %v4986_v48 = vpack.c.bf16 %v6332_v58, %v6318_v34  ;;  %v2029_v42 = vand.u32 4294901760, %v2028_v21  ;;  %v7759_v45 = vld [vmem:[#allocation22_spill] sm:$0xff] }
 0x126   :  { %4951 = vmatprep.subr.bf16.mxu0 %v6705_v54  ;;  %v4980_v10 = vpack.c.bf16 %v2131_v17, %v2124_v14  ;;  %v2138_v47 = vand.u32 4294901760, %v2137_v28  ;;  %v2145_v51 = vand.u32 4294901760, %v2144_v56  ;;  %v4988_v55 = vpack.c.bf16 %v6338_v3, %v6336_v24  ;;  %v7762_v28 = vld [vmem:[#allocation17_spill] sm:$0xff]  ;;  %v7763_v56 = vld [vmem:[#allocation14_spill] sm:$0xff] }
 0x127   :  { %v4982_v4 = vpack.c.bf16 %v2257_v63, %v2250_v2  ;;  %v4990_v0 = vpack.c.bf16 %v6385_v32, %v6383_v43  ;;  %v4992_v37 = vpack.c.bf16 %v6399_v46, %v6397_v20  ;;  %v4994_v57 = vpack.c.bf16 %v6425_v7, %v6420_v39  ;;  %v7765_v2 = vld [vmem:[#allocation19_spill] sm:$0xff] }
 0x128   :  { %4977 = vmatpush3.bf16.msra.mxu1 %v4976_v11  ;;  %v4984_v12 = vpack.c.bf16 %v2145_v51, %v2138_v47  ;;  %v4996_v27 = vpack.c.bf16 %v6443_v31, %v7759_v45  ;;  %v4998_v50 = vpack.c.bf16 %v6459_v6, %v6457_v13  ;;  %v7760_v11 = vld [vmem:[#allocation18_spill] sm:$0xff]  ;;  %v7761_v21 = vand.u32 4294901760, %v6432_v26  ;;  %v7769_v47 = vld [vmem:[#allocation24_spill] sm:$0xff] }
 0x129   :  { %4953 = vmatpush3.bf16.msra.mxu0 %v6717_v29  ;;  %4979 = vmatprep.subr.bf16.mxu1 %v4978_v38  ;;  %v5000_v14 = vpack.c.bf16 %v6480_v23, %v6478_v16  ;;  %v5002_v17 = vpack.c.bf16 %v6507_v30, %v6505_v5  ;;  %v7764_v38 = vld [vmem:[#allocation15_spill] sm:$0xff]  ;;  %v5008_v51 = vpack.c.bf16 %v6578_v44, %v6558_v19 }
 0x12a   :  { %4987 = vmatprep.subr.bf16.mxu0 %v4986_v48  ;;  %v5004_v63 = vpack.c.bf16 %v7765_v2, %v7764_v38  ;;  %v7767_v48 = vld [vmem:[#allocation13_spill] sm:$0xff] }
 0x12c   :  { %2030 = vmatmul.mubr.f32.vlgmr.msra.gmra.mrb[12].mxu0 %v2029_v42  ;;  %4981 = vmatpush3.bf16.msra.mxu1 %v4980_v10  ;;  %v7768_v10 = vld [vmem:[#allocation20_spill] sm:$0xff] }
 0x12d   :  { %4989 = vmatpush3.bf16.msra.mxu0 %v4988_v55  ;;  %4983 = vmatprep.subr.bf16.mxu1 %v4982_v4  ;;  %v5010_v55 = vpack.c.bf16 %v6590_v25, %v6583_v36 }
 0x12e   :  { %4991 = vmatprep.subr.bf16.mxu0 %v4990_v0  ;;  %2397 = vmatprep.mubr.f32.mxu0 %v6432_v26  ;;  %v7766_v26 = vld [vmem:[#allocation23_spill] sm:$0xff]  ;;  %v7770_v0 = vld [vmem:[#allocation25_spill] sm:$0xff] }
 0x12f   :  { %v5006_v42 = vpack.c.bf16 %v7767_v48, %v7766_v26 }
 0x130   :  { %4985 = vmatpush3.bf16.msra.mxu1 %v4984_v12 }
 0x131   :  { %4993 = vmatpush3.bf16.msra.mxu0 %v4992_v37  ;;  %5019 = vmatprep.subr.bf16.mxu1 %v6390_v8  ;;  %v5012_v37 = vpack.c.bf16 %v6627_v33, %v6599_v22 }
 0x132   :  { %4995 = vmatprep.subr.bf16.mxu0 %v4994_v57 }
 0x133   :  { %2262 = vmatmul.mubr.f32.vlgmr.msra.gmra.mrb[12].mxu1 %v6623_v18 }
 0x134   :  { %5021 = vmatpush3.bf16.msra.mxu1 %v7760_v11  ;;  %2504 = vmatprep.mubr.f32.mxu1 %v7761_v21  ;;  %v7772_v21 = vld [vmem:[#allocation21_spill] sm:$0xff] }
 0x135   :  { %4997 = vmatpush3.bf16.msra.mxu0 %v4996_v27  ;;  %5023 = vmatprep.subr.bf16.mxu1 %v6394_v15  ;;  %v5014_v27 = vpack.c.bf16 %v6640_v9, %v6635_v61 }
 0x136   :  { %4999 = vmatprep.subr.bf16.mxu0 %v4998_v50  ;;  %v7771_v50 = vld [vmem:[#allocation16_spill] sm:$0xff] }
 0x138   :  { %5025 = vmatpush3.bf16.msra.mxu1 %v7762_v28 }
 0x139   :  { %5001 = vmatpush3.bf16.msra.mxu0 %v5000_v14  ;;  %5027 = vmatprep.subr.bf16.mxu1 %v7763_v56  ;;  %v5016_v14 = vpack.c.bf16 %v6660_v60, %v6657_v62 }
 0x13a   :  { %5003 = vmatprep.subr.bf16.mxu0 %v5002_v17 }
 0x13c   :  { %5029 = vmatpush3.bf16.msra.mxu1 %v7768_v10 }
 0x13d   :  { %5005 = vmatpush3.bf16.msra.mxu0 %v5004_v63  ;;  %5031 = vmatprep.subr.bf16.mxu1 %v7769_v47  ;;  %v7773_v63 = vand.u32 4294901760, %v6318_v34  ;;  %v7775_v34 = vand.u32 4294901760, %v6336_v24  ;;  %v7779_v24 = vand.u32 4294901760, %v6397_v20 }
 0x13e   :  { %5007 = vmatprep.subr.bf16.mxu0 %v5006_v42  ;;  %v7774_v42 = vand.u32 4294901760, %v6332_v58  ;;  %v7776_v58 = vand.u32 4294901760, %v6338_v3  ;;  %v7780_v3 = vand.u32 4294901760, %v6399_v46 }
 0x13f   :  { %v3730_v4 = vpop.f32.mrb[0].mxu0 }
 0x140   :  { %5033 = vmatpush3.bf16.msra.mxu1 %v7770_v0  ;;  %v3731_v12 = vpop.f32.mrb[1].mxu0 }
 0x141   :  { %5009 = vmatpush3.bf16.msra.mxu0 %v5008_v51  ;;  %5035 = vmatprep.subr.bf16.mxu1 %v6493_v35  ;;  %v3732_v57 = vadd.f32 %v3731_v12, %v3730_v4  ;;  %v5050_v51 = vpack.c.bf16 %v7774_v42, %v7773_v63  ;;  %v6774_v12 = vld [vmem:[#allocation7 + $0x388] sm:$0xff]  ;;  %v7777_v42 = vand.u32 4294901760, %v6383_v43  ;;  %v5056_v43 = vpack.c.bf16 %v7780_v3, %v7779_v24 }
 0x142   :  { %5011 = vmatprep.subr.bf16.mxu0 %v5010_v55  ;;  %v6772_v55 = vld [vmem:[#allocation7 + $0x380] sm:$0xff]  ;;  %v2837_v18 = vand.u32 4294901760, %v6774_v12  ;;  %v7788_v3 = vand.u32 4294901760, %v6478_v16  ;;  %v7795_v16 = vand.u32 4294901760, %v7767_v48 }
 0x143   :  { %v2834_v40 = vand.u32 4294901760, %v6772_v55 }
 0x144   :  { %5037 = vmatpush3.bf16.msra.mxu1 %v7771_v50 }
 0x145   :  { %5013 = vmatpush3.bf16.msra.mxu0 %v5012_v37  ;;  %5039 = vmatprep.subr.bf16.mxu1 %v7772_v21  ;;  %v6777_v37 = vld [vmem:[#allocation7 + $0x300] sm:$0xff] }
 0x146   :  { %v3765_v17 = vpop.f32.mrb[0].mxu1  ;;  %5015 = vmatprep.subr.bf16.mxu0 %v5014_v27  ;;  %v5052_v27 = vpack.c.bf16 %v7776_v58, %v7775_v34  ;;  %v7783_v34 = vld [vmem:[#allocation12_spill] sm:$0xff]  ;;  %v6809_v58 = vsub.f32 %v6772_v55, %v2834_v40 }
 0x147   :  { %v3766_v4 = vpop.f32.mrb[1].mxu1 }
 0x148   :  { %v3767_v49 = vadd.f32 %v3766_v4, %v3765_v17  ;;  %5041 = vmatpush3.bf16.msra.mxu1 %v6556_v52  ;;  %v7778_v17 = vand.u32 4294901760, %v6385_v32  ;;  %v173_v32 = vld [vmem:[#allocation7 + $0x390] sm:$0xff] }
 0x149   :  { %5017 = vmatpush3.bf16.msra.mxu0 %v5016_v14  ;;  %5043 = vmatprep.subr.bf16.mxu1 %v6678_v1  ;;  %v2786_v14 = vand.u32 4294901760, %v6777_v37  ;;  %v2789_v1 = vand.u32 4294901760, %v6779_v53 }
 0x14a   :  { %v6786_v63 = vadd.f32 %v3767_v49, %v3732_v57  ;;  %5051 = vmatprep.subr.bf16.mxu0 %v5050_v51  ;;  %v5054_v4 = vpack.c.bf16 %v7778_v17, %v7777_v42  ;;  %v7781_v49 = vand.u32 4294901760, %v6420_v39  ;;  %v7782_v57 = vand.u32 4294901760, %v6425_v7  ;;  %v174_v42 = vld [vmem:[#allocation7 + $0x398] sm:$0xff] }
 0x14b   :  { %v6817_v20 = vsub.f32 %v6777_v37, %v2786_v14  ;;  %v6820_v46 = vsub.f32 %v6779_v53, %v2789_v1  ;;  %v7784_v39 = vand.u32 4294901760, %v7759_v45  ;;  %v7785_v7 = vand.u32 4294901760, %v6443_v31 }
 0x14c   :  { %2400 = vmatmul.mubr.f32.vlgmr.msra.gmra.mrb[14].mxu0 %v6653_v59  ;;  %5045 = vmatpush3.bf16.msra.mxu1 %v6682_v41  ;;  %v5058_v51 = vpack.c.bf16 %v7782_v57, %v7781_v49  ;;  %v2840_v17 = vand.u32 4294901760, %v173_v32  ;;  %v7789_v53 = vand.u32 4294901760, %v6480_v23  ;;  %v7790_v57 = vand.u32 4294901760, %v6505_v5 }
 0x14d   :  { %5053 = vmatpush3.bf16.msra.mxu0 %v5052_v27  ;;  %5047 = vmatprep.subr.bf16.mxu1 %v6705_v54  ;;  %v6812_v27 = vsub.f32 %v6774_v12, %v2837_v18  ;;  %v5060_v55 = vpack.c.bf16 %v7785_v7, %v7784_v39  ;;  %v7786_v12 = vand.u32 4294901760, %v6457_v13  ;;  %v7791_v45 = vand.u32 4294901760, %v6507_v30  ;;  %v157_v7 = vld [vmem:[#allocation7 + $0x310] sm:$0xff] }
 0x14e   :  { %5055 = vmatprep.subr.bf16.mxu0 %v5054_v4  ;;  %2674 = vmatprep.mubr.f32.mxu0 %v7783_v34  ;;  %v7787_v4 = vand.u32 4294901760, %v6459_v6  ;;  %v5064_v49 = vpack.c.bf16 %v7789_v53, %v7788_v3  ;;  %v2843_v39 = vand.u32 4294901760, %v174_v42  ;;  %v7793_v13 = vand.u32 4294901760, %v7765_v2 }
 0x14f   :  { %v5066_v31 = vpack.c.bf16 %v7791_v45, %v7790_v57  ;;  %v7546_v5 = vand.u32 4294901760, %v6809_v58  ;;  %v7545_v30 = vand.u32 4294901760, %v6812_v27  ;;  %v7799_v2 = vand.u32 4294901760, %v6583_v36  ;;  %v6868_v45 = vld [vmem:[#allocation2 + $0x18] sm:$0xff] }
 0x150   :  { %5049 = vmatpush3.bf16.msra.mxu1 %v6717_v29  ;;  %v5062_v24 = vpack.c.bf16 %v7787_v4, %v7786_v12  ;;  %v7794_v12 = vand.u32 4294901760, %v7766_v26  ;;  %v7796_v4 = vand.u32 4294901760, %v6653_v59  ;;  %v7800_v26 = vand.u32 4294901760, %v6590_v25 }
 0x151   :  { %5057 = vmatpush3.bf16.msra.mxu0 %v5056_v43  ;;  %5083 = vmatprep.subr.bf16.mxu1 %v6390_v8  ;;  %v158_v43 = vld [vmem:[#allocation7 + $0x318] sm:$0xff]  ;;  %v7792_v8 = vand.u32 4294901760, %v7764_v38  ;;  %v7798_v38 = vand.u32 4294901760, %v6578_v44  ;;  %v7540_v53 = vand.u32 4294901760, %v6817_v20  ;;  %v7537_v57 = vand.u32 4294901760, %v6820_v46 }
 0x152   :  { %5059 = vmatprep.subr.bf16.mxu0 %v5058_v51  ;;  %v6848_v23 = vpack.c.bf16 %v7795_v16, %v7794_v12  ;;  %v7797_v51 = vand.u32 4294901760, %v6558_v19  ;;  %v6864_v48 = vpack.c.bf16 %v7800_v26, %v7799_v2  ;;  %v7801_v19 = vand.u32 4294901760, %v6599_v22  ;;  %v176_v12 = vld [vmem:[#allocation7 + $0x3a8] sm:$0xff] }
 0x153   :  { %v5068_v6 = vpack.c.bf16 %v7793_v13, %v7792_v8  ;;  %2508 = vmatmul.mubr.f32.vlgmr.msra.gmra.mrb[14].mxu1 %v7796_v4  ;;  %v7802_v44 = vand.u32 4294901760, %v6627_v33  ;;  %v6877_v8 = vsub.f32 %v173_v32, %v2840_v17  ;;  %v2792_v36 = vand.u32 4294901760, %v157_v7  ;;  %v175_v13 = vld [vmem:[#allocation7 + $0x3a0] sm:$0xff] }
 0x154   :  { %v6858_v3 = vpack.c.bf16 %v7798_v38, %v7797_v51  ;;  %5085 = vmatpush3.bf16.msra.mxu1 %v7760_v11  ;;  %v2795_v25 = vand.u32 4294901760, %v158_v43  ;;  %2778 = vmatprep.mubr.f32.mxu1 %v7783_v34  ;;  %v7803_v16 = vand.u32 4294901760, %v6635_v61  ;;  %v7804_v11 = vand.u32 4294901760, %v6640_v9  ;;  %v159_v9 = vld [vmem:[#allocation7 + $0x320] sm:$0xff] }
 0x155   :  { %v6875_v59 = vpack.c.bf16 %v7802_v44, %v7801_v19  ;;  %5061 = vmatpush3.bf16.msra.mxu0 %v5060_v55  ;;  %5087 = vmatprep.subr.bf16.mxu1 %v6394_v15  ;;  %v7805_v33 = vand.u32 4294901760, %v6657_v62  ;;  %v7806_v32 = vand.u32 4294901760, %v6660_v60  ;;  %v6893_v51 = vsub.f32 %v174_v42, %v2843_v39  ;;  %v160_v55 = vld [vmem:[#allocation7 + $0x328] sm:$0xff] }
 0x156   :  { %v6885_v22 = vpack.c.bf16 %v7804_v11, %v7803_v16  ;;  %5063 = vmatprep.subr.bf16.mxu0 %v5062_v24  ;;  %v6895_v34 = vpack.c.bf16 %v2837_v18, %v2834_v40  ;;  %v3013_v15 = vsub.f32 %v6809_v58, %v7546_v5  ;;  %v3020_v61 = vsub.f32 %v6812_v27, %v7545_v30  ;;  %v177_v11 = vld [vmem:[#allocation7 + $0x3b0] sm:$0xff] }
 0x157   :  { %v6891_v4 = vpack.c.bf16 %v7806_v32, %v7805_v33  ;;  %v194_v62 = vcombine.high %v6868_v45, %v6868_v45  ;;  %v2846_v60 = vand.u32 4294901760, %v175_v13  ;;  %v2849_v38 = vand.u32 4294901760, %v176_v12  ;;  %v178_v33 = vld [vmem:[#allocation7 + $0x3b8] sm:$0xff] }
 0x158   :  { %v2901_v18 = vsub.f32 %v6817_v20, %v7540_v53  ;;  %v2908_v40 = vsub.f32 %v6820_v46, %v7537_v57  ;;  %5089 = vmatpush3.bf16.msra.mxu1 %v7762_v28  ;;  %v6914_v42 = vpack.c.bf16 %v2789_v1, %v2786_v14  ;;  %v6916_v24 = vpack.c.bf16 %v2843_v39, %v2840_v17 }
 0x159   :  { %v6918_v2 = vpack.c.bf16 %v2795_v25, %v2792_v36  ;;  %v7539_v26 = vand.u32 4294901760, %v6877_v8  ;;  %5065 = vmatpush3.bf16.msra.mxu0 %v5064_v49  ;;  %5091 = vmatprep.subr.bf16.mxu1 %v7763_v56  ;;  %v6922_v19 = vsub.f32 %v157_v7, %v2792_v36  ;;  %v2798_v44 = vand.u32 4294901760, %v159_v9 }
 0x15a   :  { %7807 = vst [vmem:[#allocation22_spill] sm:$0xff] %v6914_v42  ;;  %7808 = vst [vmem:[#allocation18_spill] sm:$0xff] %v6916_v24  ;;  %v2801_v16 = vand.u32 4294901760, %v160_v55  ;;  %v7538_v28 = vand.u32 4294901760, %v6893_v51  ;;  %5067 = vmatprep.subr.bf16.mxu0 %v5066_v31  ;;  %v6925_v1 = vsub.f32 %v158_v43, %v2795_v25  ;;  %v3014_v37 = vand.u32 4294901760, %v3013_v15  ;;  %v161_v43 = vld [vmem:[#allocation7 + $0x330] sm:$0xff] }
 0x15b   :  { %v3021_v14 = vand.u32 4294901760, %v3020_v61  ;;  %v6927_v17 = vand.u32 4294901760, %v194_v62  ;;  %v6929_v39 = vpack.c.bf16 %v2849_v38, %v2846_v60  ;;  %v6931_v49 = vsub.f32 %v175_v13, %v2846_v60  ;;  %v162_v25 = vld [vmem:[#allocation7 + $0x338] sm:$0xff] }
 0x15c   :  { %v2902_v56 = vand.u32 4294901760, %v2901_v18  ;;  %v2909_v7 = vand.u32 4294901760, %v2908_v40  ;;  %5093 = vmatpush3.bf16.msra.mxu1 %v7768_v10  ;;  %v6934_v36 = vsub.f32 %v176_v12, %v2849_v38  ;;  %v2852_v32 = vand.u32 4294901760, %v177_v11  ;;  %v179_v12 = vld [vmem:[#allocation7 + $0x3c0] sm:$0xff] }
 0x15d   :  { %7809 = vst [vmem:[#allocation17_spill] sm:$0xff] %v6927_v17  ;;  %v2855_v57 = vand.u32 4294901760, %v178_v33  ;;  %v3027_v31 = vsub.f32 %v6877_v8, %v7539_v26  ;;  %5069 = vmatpush3.bf16.msra.mxu0 %v5068_v6  ;;  %5095 = vmatprep.subr.bf16.mxu1 %v7769_v47  ;;  %v6940_v15 = vpack.c.bf16 %v2801_v16, %v2798_v44  ;;  %v7544_v38 = vand.u32 4294901760, %v6922_v19 }
 0x15e   :  { %v6942_v13 = vsub.f32 %v159_v9, %v2798_v44  ;;  %v3034_v10 = vsub.f32 %v6893_v51, %v7538_v28  ;;  %5071 = vmatprep.subr.bf16.mxu0 %v6848_v23  ;;  %v6948_v61 = vpack.c.bf16 %v3021_v14, %v3014_v37  ;;  %v6950_v60 = vsub.f32 %v160_v55, %v2801_v16  ;;  %v180_v28 = vld [vmem:[#allocation7 + $0x3c8] sm:$0xff] }
 0x15f   :  { %7810 = vst [vmem:[#allocation14_spill] sm:$0xff] %v6940_v15  ;;  %v6954_v6 = vsub.f32 %v194_v62, %v6927_v17  ;;  %v3800_v47 = vpop.f32.mrb[2].mxu0  ;;  %v6956_v18 = vpack.c.bf16 %v2909_v7, %v2902_v56  ;;  %v2804_v9 = vand.u32 4294901760, %v161_v43  ;;  %v2807_v40 = vand.u32 4294901760, %v162_v25 }
 0x160   :  { %v7542_v44 = vand.u32 4294901760, %v6925_v1  ;;  %v3801_v26 = vpop.f32.mrb[3].mxu0  ;;  %5097 = vmatpush3.bf16.msra.mxu1 %v7770_v0  ;;  %v6960_v23 = vpack.c.bf16 %v2855_v57, %v2852_v32  ;;  %v6962_v55 = vsub.f32 %v177_v11, %v2852_v32  ;;  %v3028_v16 = vand.u32 4294901760, %v3027_v31 }
 0x161   :  { %v2858_v37 = vand.u32 4294901760, %v179_v12  ;;  %v3802_v14 = vadd.f32 %v3801_v26, %v3800_v47  ;;  %5073 = vmatpush3.bf16.msra.mxu0 %v6858_v3  ;;  %5099 = vmatprep.subr.bf16.mxu1 %v6493_v35  ;;  %v3035_v62 = vand.u32 4294901760, %v3034_v10  ;;  %v7541_v56 = vand.u32 4294901760, %v6931_v49 }
 0x162   :  { %7811 = vst [vmem:[#allocation15_spill] sm:$0xff] %v6960_v23  ;;  %v7543_v7 = vand.u32 4294901760, %v6934_v36  ;;  %5075 = vmatprep.subr.bf16.mxu0 %v6864_v48  ;;  %v6969_v53 = vsub.f32 %v178_v33, %v2855_v57  ;;  %v2915_v0 = vsub.f32 %v6922_v19, %v7544_v38  ;;  %v2861_v11 = vand.u32 4294901760, %v180_v28  ;;  %v163_v33 = vld [vmem:[#allocation7 + $0x340] sm:$0xff] }
 0x163   :  { %v7548_v26 = vand.u32 4294901760, %v6954_v6  ;;  %v678_v3 = vadd.f32 %v3802_v14, %v6786_v63  ;;  %v6976_v32 = vpack.c.bf16 %v2807_v40, %v2804_v9  ;;  %v6978_v35 = vsub.f32 %v161_v43, %v2804_v9 }
 0x164   :  { %v2922_v31 = vsub.f32 %v6925_v1, %v7542_v44  ;;  %5101 = vmatpush3.bf16.msra.mxu1 %v7771_v50  ;;  %v6984_v48 = vsub.f32 %v162_v25, %v2807_v40  ;;  %v6986_v57 = vsub.f32 %v179_v12, %v2858_v37  ;;  %v7547_v10 = vand.u32 4294901760, %v6942_v13  ;;  %v164_v25 = vld [vmem:[#allocation7 + $0x348] sm:$0xff]  ;;  %v182_v44 = vld [vmem:[#allocation7 + $0x3d8] sm:$0xff] }
 0x165   :  { %7812 = vst [vmem:[#allocation19_spill] sm:$0xff] %v6976_v32  ;;  %7813 = vst [vmem:[#allocation23_spill] sm:$0xff] %v6978_v35  ;;  %v7549_v47 = vand.u32 4294901760, %v6950_v60  ;;  %5077 = vmatpush3.bf16.msra.mxu0 %v6875_v59  ;;  %5103 = vmatprep.subr.bf16.mxu1 %v7772_v21  ;;  %v6992_v63 = vpack.c.bf16 %v3035_v62, %v3028_v16  ;;  %v3041_v43 = vsub.f32 %v6931_v49, %v7541_v56  ;;  %v181_v21 = vld [vmem:[#allocation7 + $0x3d0] sm:$0xff] }
 0x166   :  { %7814 = vst [vmem:[#allocation13_spill] sm:$0xff] %v6984_v48  ;;  %v3048_v50 = vsub.f32 %v6934_v36, %v7543_v7  ;;  %v3835_v12 = vpop.f32.mrb[2].mxu1  ;;  %5079 = vmatprep.subr.bf16.mxu0 %v6885_v22  ;;  %v2916_v9 = vand.u32 4294901760, %v2915_v0  ;;  %v7001_v40 = vpack.c.bf16 %v2861_v11, %v2858_v37  ;;  %v7003_v59 = vsub.f32 %v180_v28, %v2861_v11  ;;  %v7816_v0 = vld [vmem:[#allocation27_spill] sm:$0xff] }
 0x167   :  { %v2884_v16 = vsub.f32 %v6954_v6, %v7548_v26  ;;  %v3836_v14 = vpop.f32.mrb[3].mxu1  ;;  %v2923_v62 = vand.u32 4294901760, %v2922_v31  ;;  %v2810_v56 = vand.u32 4294901760, %v163_v33  ;;  %v2813_v22 = vand.u32 4294901760, %v164_v25  ;;  %v165_v26 = vld [vmem:[#allocation7 + $0x350] sm:$0xff] }
 0x168   :  { %7815 = vst [vmem:[#allocation20_spill] sm:$0xff] %v7001_v40  ;;  %v3837_v30 = vadd.f32 %v3836_v14, %v3835_v12  ;;  %5105 = vmatpush3.bf16.msra.mxu1 %v6556_v52  ;;  %v2929_v28 = vsub.f32 %v6942_v13, %v7547_v10  ;;  %v2936_v37 = vsub.f32 %v6950_v60, %v7549_v47  ;;  %v3042_v11 = vand.u32 4294901760, %v3041_v43 }
 0x169   :  { %5081 = vmatpush3.bf16.msra.mxu0 %v6891_v4  ;;  %5107 = vmatprep.subr.bf16.mxu1 %v7816_v0  ;;  %v3049_v31 = vand.u32 4294901760, %v3048_v50  ;;  %v7552_v5 = vand.u32 4294901760, %v6978_v35  ;;  %v2864_v14 = vand.u32 4294901760, %v181_v21  ;;  %v2867_v10 = vand.u32 4294901760, %v182_v44 }
 0x16a   :  { %v7021_v52 = vadd.f32 %v3837_v30, %v678_v3  ;;  %5115 = vmatprep.subr.bf16.mxu0 %v6895_v34  ;;  %v2885_v38 = vand.u32 4294901760, %v2884_v16  ;;  %v7024_v7 = vpack.c.bf16 %v2923_v62, %v2916_v9  ;;  %v7026_v47 = vsub.f32 %v163_v33, %v2810_v56  ;;  %v7820_v30 = vld [vmem:[#allocation26_spill] sm:$0xff]  ;;  %v166_v33 = vld [vmem:[#allocation7 + $0x358] sm:$0xff]  ;;  %v7040_v62 = vld [vmem:[#allocation7 + $0x3e0] sm:$0xff] }
 0x16b   :  { %v7818_v4 = vand.u32 4294901760, %v6962_v55  ;;  %v7819_v50 = vand.u32 4294901760, %v6969_v53  ;;  %v7036_v3 = vpack.c.bf16 %v2813_v22, %v2810_v56  ;;  %v7038_v12 = vsub.f32 %v164_v25, %v2813_v22  ;;  %v7052_v22 = vld [vmem:[#allocation7 + $0x3e8] sm:$0xff] }
 0x16c   :  { %7817 = vst [vmem:[#allocation24_spill] sm:$0xff] %v7026_v47  ;;  %2676 = vmatmul.mubr.f32.vlgmr.msra.gmra.mrb[16].mxu0 %v7820_v30  ;;  %5109 = vmatpush3.bf16.msra.mxu1 %v6682_v41  ;;  %v2930_v9 = vand.u32 4294901760, %v2929_v28  ;;  %v2937_v16 = vand.u32 4294901760, %v2936_v37  ;;  %v2943_v41 = vsub.f32 %v6978_v35, %v7552_v5  ;;  %v7823_v56 = vand.u32 4294901760, %v6984_v48 }
 0x16d   :  { %v3055_v43 = vsub.f32 %v6962_v55, %v7818_v4  ;;  %v3062_v0 = vsub.f32 %v6969_v53, %v7819_v50  ;;  %7821 = vst [vmem:[#allocation25_spill] sm:$0xff] %v7036_v3  ;;  %7822 = vst [vmem:[#allocation16_spill] sm:$0xff] %v7038_v12  ;;  %5117 = vmatpush3.bf16.msra.mxu0 %v6914_v42  ;;  %5111 = vmatprep.subr.bf16.mxu1 %v6705_v54  ;;  %v2816_v50 = vand.u32 4294901760, %v165_v26 }
 0x16e   :  { %v7044_v4 = vpack.c.bf16 %v3049_v31, %v3042_v11  ;;  %v2950_v25 = vsub.f32 %v6984_v48, %v7823_v56  ;;  %5119 = vmatprep.subr.bf16.mxu0 %v6916_v24  ;;  %v7055_v28 = vpack.c.bf16 %v2867_v10, %v2864_v14  ;;  %v7057_v37 = vsub.f32 %v181_v21, %v2864_v14  ;;  %v7061_v11 = vld [vmem:[#allocation7 + $0x360] sm:$0xff]  ;;  %v7074_v14 = vld [vmem:[#allocation7 + $0x368] sm:$0xff] }
 0x16f   :  { %v7059_v54 = vsub.f32 %v182_v44, %v2867_v10  ;;  %2886 = vmatprep.mubr.f32.mxu0 %v2885_v38  ;;  %v3056_v31 = vand.u32 4294901760, %v3055_v43  ;;  %v3063_v42 = vand.u32 4294901760, %v3062_v0  ;;  %v2819_v5 = vand.u32 4294901760, %v166_v33 }
 0x170   :  { %7824 = vst [vmem:[#allocation21_spill] sm:$0xff] %v7057_v37  ;;  %v7562_v35 = vand.u32 4294901760, %v7040_v62  ;;  %5113 = vmatpush3.bf16.msra.mxu1 %v6717_v29  ;;  %v7065_v56 = vpack.c.bf16 %v2937_v16, %v2930_v9  ;;  %v7560_v48 = vand.u32 4294901760, %v7052_v22  ;;  %v7559_v24 = vand.u32 4294901760, %v6986_v57  ;;  %v7080_v9 = vld [vmem:[#allocation7 + $0x3f0] sm:$0xff]  ;;  %v7082_v16 = vld [vmem:[#allocation7 + $0x3f8] sm:$0xff] }
 0x171   :  { %7825 = vst [vmem:[#allocation12_spill] sm:$0xff] %v7059_v54  ;;  %v7561_v21 = vand.u32 4294901760, %v7003_v59  ;;  %5121 = vmatpush3.bf16.msra.mxu0 %v6918_v2  ;;  %5147 = vmatprep.subr.bf16.mxu1 %v6948_v61  ;;  %v7072_v38 = vsub.f32 %v165_v26, %v2816_v50  ;;  %v2944_v44 = vand.u32 4294901760, %v2943_v41  ;;  %v2951_v10 = vand.u32 4294901760, %v2950_v25 }
 0x172   :  { %5123 = vmatprep.subr.bf16.mxu0 %v6929_v39  ;;  %v7567_v0 = vand.u32 4294901760, %v7038_v12  ;;  %v7572_v26 = vand.u32 4294901760, %v7059_v54  ;;  %v5158_v41 = vpack.c.bf16 %v3063_v42, %v3056_v31  ;;  %v7087_v25 = vpack.c.bf16 %v2819_v5, %v2816_v50 }
 0x173   :  { %2780 = vmatmul.mubr.f32.vlgmr.msra.gmra.mrb[16].mxu1 %v7820_v30  ;;  %v7089_v29 = vsub.f32 %v166_v33, %v2819_v5  ;;  %v7094_v43 = vsub.f32 %v7040_v62, %v7562_v35  ;;  %v7100_v61 = vsub.f32 %v7052_v22, %v7560_v48  ;;  %v3069_v42 = vsub.f32 %v6986_v57, %v7559_v24  ;;  %v7119_v48 = vld [vmem:[#allocation7 + $0x370] sm:$0xff] }
 0x174   :  { %5149 = vmatpush3.bf16.msra.mxu1 %v6956_v18  ;;  %v3076_v5 = vsub.f32 %v7003_v59, %v7561_v21  ;;  %v2825_v30 = vand.u32 4294901760, %v7074_v14  ;;  %3122 = vmatprep.mubr.f32.mxu1 %v6927_v17  ;;  %v5160_v18 = vpack.c.bf16 %v2951_v10, %v2944_v44  ;;  %v7828_v33 = vand.u32 4294901760, %v7061_v11  ;;  %v7121_v21 = vld [vmem:[#allocation7 + $0x378] sm:$0xff] }
 0x175   :  { %7826 = vst [vmem:[#allocation27_spill] sm:$0xff] %v7094_v43  ;;  %7827 = vst [vmem:[#allocation26_spill] sm:$0xff] %v7100_v61  ;;  %5125 = vmatpush3.bf16.msra.mxu0 %v6940_v15  ;;  %5151 = vmatprep.subr.bf16.mxu1 %v6992_v63  ;;  %v7829_v35 = vand.u32 4294901760, %v7026_v47  ;;  %v2964_v44 = vsub.f32 %v7038_v12, %v7567_v0  ;;  %v7830_v10 = vand.u32 4294901760, %v7057_v37  ;;  %v3070_v0 = vand.u32 4294901760, %v3069_v42 }
 0x176   :  { %v7115_v50 = vsub.f32 %v7061_v11, %v7828_v33  ;;  %5127 = vmatprep.subr.bf16.mxu0 %v6960_v23  ;;  %v3090_v24 = vsub.f32 %v7059_v54, %v7572_v26  ;;  %v7139_v23 = vand.u32 4294901760, %v6868_v45  ;;  %v7144_v15 = vsub.f32 %v7074_v14, %v2825_v30 }
 0x177   :  { %v2957_v63 = vsub.f32 %v7026_v47, %v7829_v35  ;;  %v3083_v33 = vsub.f32 %v7057_v37, %v7830_v10  ;;  %v2828_v10 = vand.u32 4294901760, %v7119_v48  ;;  %v2831_v37 = vand.u32 4294901760, %v7121_v21 }
 0x178   :  { %5153 = vmatpush3.bf16.msra.mxu1 %v7024_v7  ;;  %v3077_v26 = vand.u32 4294901760, %v3076_v5  ;;  %v7831_v17 = vand.u32 4294901760, %v7080_v9  ;;  %v7832_v7 = vand.u32 4294901760, %v7082_v16  ;;  %v2965_v54 = vand.u32 4294901760, %v2964_v44 }
 0x179   :  { %5129 = vmatpush3.bf16.msra.mxu0 %v6976_v32  ;;  %5155 = vmatprep.subr.bf16.mxu1 %v7044_v4  ;;  %v2958_v35 = vand.u32 4294901760, %v2957_v63  ;;  %v3084_v32 = vand.u32 4294901760, %v3083_v33  ;;  %v3091_v12 = vand.u32 4294901760, %v3090_v24  ;;  %v7833_v4 = vand.u32 4294901760, %v7072_v38 }
 0x17a   :  { %v7153_v31 = vsub.f32 %v7080_v9, %v7831_v17  ;;  %v7158_v42 = vsub.f32 %v7082_v16, %v7832_v7  ;;  %5131 = vmatprep.subr.bf16.mxu0 %v7001_v40  ;;  %v7834_v17 = vand.u32 4294901760, %v7089_v29  ;;  %v7170_v7 = vsub.f32 %v6868_v45, %v7139_v23 }
 0x17b   :  { %v2971_v5 = vsub.f32 %v7072_v38, %v7833_v4  ;;  %v7835_v14 = vand.u32 4294901760, %v7094_v43  ;;  %v7177_v24 = vsub.f32 %v7119_v48, %v2828_v10  ;;  %v7180_v63 = vsub.f32 %v7121_v21, %v2831_v37 }
 0x17c   :  { %v2978_v47 = vsub.f32 %v7089_v29, %v7834_v17  ;;  %5157 = vmatpush3.bf16.msra.mxu1 %v7065_v56  ;;  %v5162_v45 = vpack.c.bf16 %v3077_v26, %v3070_v0  ;;  %v7836_v4 = vand.u32 4294901760, %v7100_v61  ;;  %v7837_v21 = vand.u32 4294901760, %v7040_v62 }
 0x17d   :  { %v3097_v40 = vsub.f32 %v7094_v43, %v7835_v14  ;;  %5133 = vmatpush3.bf16.msra.mxu0 %v7036_v3  ;;  %5159 = vmatprep.subr.bf16.mxu1 %v5158_v41  ;;  %v7838_v17 = vand.u32 4294901760, %v7052_v22  ;;  %v7839_v33 = vand.u32 4294901760, %v7061_v11  ;;  %v5164_v0 = vpack.c.bf16 %v2965_v54, %v2958_v35 }
 0x17e   :  { %v3104_v14 = vsub.f32 %v7100_v61, %v7836_v4  ;;  %5135 = vmatprep.subr.bf16.mxu0 %v7055_v28  ;;  %v5166_v26 = vpack.c.bf16 %v3091_v12, %v3084_v32  ;;  %v2972_v4 = vand.u32 4294901760, %v2971_v5  ;;  %v2979_v61 = vand.u32 4294901760, %v2978_v47 }
 0x17f   :  { %v7195_v44 = vpack.c.bf16 %v7838_v17, %v7837_v21  ;;  %v7199_v41 = vpack.c.bf16 %v2825_v30, %v7839_v33  ;;  %v3870_v3 = vpop.f32.mrb[4].mxu0  ;;  %v2889_v56 = vand.u32 4294901760, %v7170_v7  ;;  %v3098_v48 = vand.u32 4294901760, %v3097_v40 }
 0x180   :  { %v3871_v43 = vpop.f32.mrb[5].mxu0  ;;  %5161 = vmatpush3.bf16.msra.mxu1 %v5160_v18  ;;  %v7840_v62 = vand.u32 4294901760, %v7115_v50  ;;  %v7841_v21 = vand.u32 4294901760, %v7144_v15  ;;  %v7590_v30 = vand.u32 4294901760, %v7177_v24  ;;  %v7589_v32 = vand.u32 4294901760, %v7180_v63 }
 0x181   :  { %v3872_v12 = vadd.f32 %v3871_v43, %v3870_v3  ;;  %5137 = vmatpush3.bf16.msra.mxu0 %v7087_v25  ;;  %5163 = vmatprep.subr.bf16.mxu1 %v5162_v45  ;;  %v3105_v47 = vand.u32 4294901760, %v3104_v14  ;;  %v7842_v40 = vand.u32 4294901760, %v7153_v31  ;;  %v7843_v18 = vand.u32 4294901760, %v7158_v42 }
 0x182   :  { %v2985_v22 = vsub.f32 %v7115_v50, %v7840_v62  ;;  %v2992_v11 = vsub.f32 %v7144_v15, %v7841_v21  ;;  %5139 = vmatprep.subr.bf16.mxu0 %v7195_v44  ;;  %v7844_v5 = vand.u32 4294901760, %v7080_v9  ;;  %v7845_v33 = vand.u32 4294901760, %v7082_v16 }
 0x183   :  { %v3111_v54 = vsub.f32 %v7153_v31, %v7842_v40  ;;  %v3118_v35 = vsub.f32 %v7158_v42, %v7843_v18  ;;  %v954_v3 = vadd.f32 %v3872_v12, %v7021_v52  ;;  %v5168_v43 = vpack.c.bf16 %v2979_v61, %v2972_v4 }
 0x184   :  { %v7222_v17 = vpack.c.bf16 %v7845_v33, %v7844_v5  ;;  %v2890_v45 = vsub.f32 %v7170_v7, %v2889_v56  ;;  %5165 = vmatpush3.bf16.msra.mxu1 %v5164_v0  ;;  %v2986_v14 = vand.u32 4294901760, %v2985_v22  ;;  %v2993_v62 = vand.u32 4294901760, %v2992_v11 }
 0x185   :  { %v2999_v21 = vsub.f32 %v7177_v24, %v7590_v30  ;;  %v3006_v9 = vsub.f32 %v7180_v63, %v7589_v32  ;;  %5141 = vmatpush3.bf16.msra.mxu0 %v7199_v41  ;;  %5167 = vmatprep.subr.bf16.mxu1 %v5166_v26  ;;  %v7235_v52 = vpack.c.bf16 %v2831_v37, %v2828_v10  ;;  %v3112_v61 = vand.u32 4294901760, %v3111_v54 }
 0x186   :  { %v5170_v16 = vpack.c.bf16 %v3105_v47, %v3098_v48  ;;  %v3119_v4 = vand.u32 4294901760, %v3118_v35  ;;  %v3905_v12 = vpop.f32.mrb[4].mxu1  ;;  %5143 = vmatprep.subr.bf16.mxu0 %v7222_v17  ;;  %v5178_v0 = vpack.c.bf16 %v6812_v27, %v6809_v58  ;;  %v2891_v11 = vand.u32 4294901760, %v2890_v45  ;;  %v7846_v45 = vld [vmem:[#allocation22_spill] sm:$0xff] }
 0x187   :  { %v3906_v22 = vpop.f32.mrb[5].mxu1  ;;  %v5172_v18 = vpack.c.bf16 %v2993_v62, %v2986_v14  ;;  %v3000_v5 = vand.u32 4294901760, %v2999_v21  ;;  %v3007_v33 = vand.u32 4294901760, %v3006_v9  ;;  %v5180_v37 = vpack.c.bf16 %v6820_v46, %v6817_v20  ;;  %v7848_v62 = vld [vmem:[#allocation18_spill] sm:$0xff]  ;;  %v7849_v21 = vld [vmem:[#allocation23_spill] sm:$0xff]  ;;  %v7850_v9 = vld [vmem:[#allocation13_spill] sm:$0xff] }
 0x188   :  { %v3907_v40 = vadd.f32 %v3906_v22, %v3905_v12  ;;  %5169 = vmatpush3.bf16.msra.mxu1 %v5168_v43  ;;  %v5174_v10 = vpack.c.bf16 %v3119_v4, %v3112_v61  ;;  %v5182_v26 = vpack.c.bf16 %v6893_v51, %v6877_v8  ;;  %v5184_v54 = vpack.c.bf16 %v6925_v1, %v6922_v19  ;;  %v7851_v4 = vld [vmem:[#allocation24_spill] sm:$0xff] }
 0x189   :  { %5145 = vmatpush3.bf16.msra.mxu0 %v7235_v52  ;;  %5171 = vmatprep.subr.bf16.mxu1 %v5170_v16  ;;  %v5176_v47 = vpack.c.bf16 %v3007_v33, %v3000_v5  ;;  %v5186_v35 = vpack.c.bf16 %v6934_v36, %v6931_v49  ;;  %v5190_v43 = vpack.c.bf16 %v6969_v53, %v6962_v55  ;;  %v7847_v14 = vand.u32 4294901760, %v6954_v6  ;;  %v7852_v12 = vld [vmem:[#allocation16_spill] sm:$0xff]  ;;  %v7857_v33 = vld [vmem:[#allocation27_spill] sm:$0xff] }
 0x18a   :  { %v1058_v48 = vadd.f32 %v3907_v40, %v954_v3  ;;  %5179 = vmatprep.subr.bf16.mxu0 %v5178_v0  ;;  %v5188_v3 = vpack.c.bf16 %v6950_v60, %v6942_v13  ;;  %v5192_v16 = vpack.c.bf16 %v7850_v9, %v7849_v21  ;;  %v5194_v61 = vpack.c.bf16 %v7003_v59, %v6986_v57  ;;  %v7854_v22 = vld [vmem:[#allocation12_spill] sm:$0xff]  ;;  %v7855_v40 = vld [vmem:[#allocation14_spill] sm:$0xff] }
 0x18b   :  { %v5196_v0 = vpack.c.bf16 %v7852_v12, %v7851_v4  ;;  %v5200_v5 = vpack.c.bf16 %v7089_v29, %v7072_v38 }
 0x18c   :  { %2892 = vmatmul.mubr.f32.vlgmr.msra.gmra.mrb[18].mxu0 %v2891_v11  ;;  %5173 = vmatpush3.bf16.msra.mxu1 %v5172_v18  ;;  %v7856_v18 = vld [vmem:[#allocation15_spill] sm:$0xff] }
 0x18d   :  { %5181 = vmatpush3.bf16.msra.mxu0 %v5180_v37  ;;  %5175 = vmatprep.subr.bf16.mxu1 %v5174_v10  ;;  %v7858_v37 = vld [vmem:[#allocation26_spill] sm:$0xff] }
 0x18e   :  { %5183 = vmatprep.subr.bf16.mxu0 %v5182_v26  ;;  %3259 = vmatprep.mubr.f32.mxu0 %v6954_v6  ;;  %v7853_v6 = vld [vmem:[#allocation21_spill] sm:$0xff]  ;;  %v5202_v10 = vpack.c.bf16 %v7858_v37, %v7857_v33 }
 0x18f   :  { %v5198_v11 = vpack.c.bf16 %v7854_v22, %v7853_v6 }
 0x190   :  { %5177 = vmatpush3.bf16.msra.mxu1 %v5176_v47 }
 0x191   :  { %5185 = vmatpush3.bf16.msra.mxu0 %v5184_v54  ;;  %5211 = vmatprep.subr.bf16.mxu1 %v6895_v34  ;;  %v7859_v54 = vld [vmem:[#allocation19_spill] sm:$0xff] }
 0x192   :  { %5187 = vmatprep.subr.bf16.mxu0 %v5186_v35 }
 0x193   :  { %3124 = vmatmul.mubr.f32.vlgmr.msra.gmra.mrb[18].mxu1 %v7139_v23 }
 0x194   :  { %5213 = vmatpush3.bf16.msra.mxu1 %v7846_v45  ;;  %3366 = vmatprep.mubr.f32.mxu1 %v7847_v14  ;;  %v5206_v14 = vpack.c.bf16 %v7158_v42, %v7153_v31 }
 0x195   :  { %5189 = vmatpush3.bf16.msra.mxu0 %v5188_v3  ;;  %5215 = vmatprep.subr.bf16.mxu1 %v7848_v62  ;;  %v7860_v3 = vld [vmem:[#allocation20_spill] sm:$0xff] }
 0x196   :  { %5191 = vmatprep.subr.bf16.mxu0 %v5190_v43  ;;  %v5204_v43 = vpack.c.bf16 %v7144_v15, %v7115_v50 }
 0x198   :  { %5217 = vmatpush3.bf16.msra.mxu1 %v6918_v2 }
 0x199   :  { %5193 = vmatpush3.bf16.msra.mxu0 %v5192_v16  ;;  %5219 = vmatprep.subr.bf16.mxu1 %v6929_v39 }
 0x19a   :  { %5195 = vmatprep.subr.bf16.mxu0 %v5194_v61  ;;  %v7861_v61 = vld [vmem:[#allocation25_spill] sm:$0xff] }
 0x19c   :  { %5221 = vmatpush3.bf16.msra.mxu1 %v7855_v40 }
 0x19d   :  { %5197 = vmatpush3.bf16.msra.mxu0 %v5196_v0  ;;  %5223 = vmatprep.subr.bf16.mxu1 %v7856_v18  ;;  %v5208_v0 = vpack.c.bf16 %v7180_v63, %v7177_v24 }
 0x19e   :  { %5199 = vmatprep.subr.bf16.mxu0 %v5198_v11 }
 0x19f   :  { %v3940_v26 = vpop.f32.mrb[6].mxu0 }
 0x1a0   :  { %v3941_v47 = vpop.f32.mrb[7].mxu0  ;;  %5225 = vmatpush3.bf16.msra.mxu1 %v7859_v54 }
 0x1a1   :  { %v3942_v35 = vadd.f32 %v3941_v47, %v3940_v26  ;;  %5201 = vmatpush3.bf16.msra.mxu0 %v5200_v5  ;;  %5227 = vmatprep.subr.bf16.mxu1 %v7860_v3  ;;  %v7862_v5 = vand.u32 4294901760, %v6809_v58  ;;  %v7863_v26 = vand.u32 4294901760, %v6812_v27  ;;  %v7867_v58 = vand.u32 4294901760, %v6893_v51  ;;  %v7872_v51 = vld [vmem:[#allocation17_spill] sm:$0xff] }
 0x1a2   :  { %5203 = vmatprep.subr.bf16.mxu0 %v5202_v10 }
 0x1a3   :  { %v1170_v16 = vadd.f32 %v3942_v35, %v1058_v48  ;;  %v5242_v47 = vpack.c.bf16 %v7863_v26, %v7862_v5  ;;  %v7864_v48 = vand.u32 4294901760, %v6817_v20  ;;  %v7865_v35 = vand.u32 4294901760, %v6820_v46 }
 0x1a4   :  { %5229 = vmatpush3.bf16.msra.mxu1 %v7861_v61  ;;  %v7869_v20 = vand.u32 4294901760, %v6925_v1  ;;  %v7875_v1 = vand.u32 4294901760, %v6962_v55 }
 0x1a5   :  { %5205 = vmatpush3.bf16.msra.mxu0 %v5204_v43  ;;  %5231 = vmatprep.subr.bf16.mxu1 %v7055_v28  ;;  %v5244_v43 = vpack.c.bf16 %v7865_v35, %v7864_v48 }
 0x1a6   :  { %v3975_v11 = vpop.f32.mrb[6].mxu1  ;;  %5207 = vmatprep.subr.bf16.mxu0 %v5206_v14  ;;  %v7866_v14 = vand.u32 4294901760, %v6877_v8  ;;  %v7871_v8 = vand.u32 4294901760, %v6934_v36  ;;  %v7878_v36 = vand.u32 4294901760, %v7850_v9 }
 0x1a7   :  { %v3976_v10 = vpop.f32.mrb[7].mxu1 }
 0x1a8   :  { %v3977_v32 = vadd.f32 %v3976_v10, %v3975_v11  ;;  %5233 = vmatpush3.bf16.msra.mxu1 %v7087_v25  ;;  %v5246_v27 = vpack.c.bf16 %v7867_v58, %v7866_v14  ;;  %v7873_v11 = vand.u32 4294901760, %v6942_v13 }
 0x1a9   :  { %5209 = vmatpush3.bf16.msra.mxu0 %v5208_v0  ;;  %5235 = vmatprep.subr.bf16.mxu1 %v7195_v44  ;;  %v7868_v0 = vand.u32 4294901760, %v6922_v19  ;;  %v7874_v19 = vand.u32 4294901760, %v6950_v60  ;;  %v7879_v60 = vand.u32 4294901760, %v6986_v57 }
 0x1aa   :  { %v1402_v30 = vadd.f32 %v3977_v32, %v1170_v16  ;;  %5243 = vmatprep.subr.bf16.mxu0 %v5242_v47  ;;  %v7870_v32 = vand.u32 4294901760, %v6931_v49  ;;  %v7876_v49 = vand.u32 4294901760, %v6969_v53  ;;  %v7880_v53 = vand.u32 4294901760, %v7003_v59 }
 0x1ab   :  { %v5248_v46 = vpack.c.bf16 %v7869_v20, %v7868_v0  ;;  %v5252_v5 = vpack.c.bf16 %v7874_v19, %v7873_v11  ;;  %v7887_v59 = vand.u32 4294901760, %v7857_v33  ;;  %v7892_v33 = vand.u32 4294901760, %v7158_v42 }
 0x1ac   :  { %3262 = vmatmul.mubr.f32.vlgmr.msra.gmra.mrb[20].mxu0 %v7170_v7  ;;  %5237 = vmatpush3.bf16.msra.mxu1 %v7199_v41  ;;  %v5250_v16 = vpack.c.bf16 %v7871_v8, %v7870_v32  ;;  %v5254_v26 = vpack.c.bf16 %v7876_v49, %v7875_v1  ;;  %v5258_v55 = vpack.c.bf16 %v7880_v53, %v7879_v60  ;;  %v7881_v7 = vand.u32 4294901760, %v7851_v4 }
 0x1ad   :  { %5245 = vmatpush3.bf16.msra.mxu0 %v5244_v43  ;;  %5239 = vmatprep.subr.bf16.mxu1 %v7222_v17  ;;  %v7888_v4 = vand.u32 4294901760, %v7858_v37 }
 0x1ae   :  { %5247 = vmatprep.subr.bf16.mxu0 %v5246_v27  ;;  %3536 = vmatprep.mubr.f32.mxu0 %v7872_v51 }
 0x1b0   :  { %5241 = vmatpush3.bf16.msra.mxu1 %v7235_v52 }
 0x1b1   :  { %5249 = vmatpush3.bf16.msra.mxu0 %v5248_v46  ;;  %5275 = vmatprep.subr.bf16.mxu1 %v6895_v34  ;;  %v7877_v34 = vand.u32 4294901760, %v7849_v21  ;;  %v7884_v21 = vand.u32 4294901760, %v7854_v22 }
 0x1b2   :  { %5251 = vmatprep.subr.bf16.mxu0 %v5250_v16 }
 0x1b3   :  { %3370 = vmatmul.mubr.f32.vlgmr.msra.gmra.mrb[20].mxu1 %v2889_v56  ;;  %v5256_v13 = vpack.c.bf16 %v7878_v36, %v7877_v34  ;;  %v7882_v56 = vand.u32 4294901760, %v7852_v12  ;;  %v5266_v12 = vpack.c.bf16 %v7888_v4, %v7887_v59 }
 0x1b4   :  { %5277 = vmatpush3.bf16.msra.mxu1 %v7846_v45  ;;  %3640 = vmatprep.mubr.f32.mxu1 %v7872_v51 }
 0x1b5   :  { %5253 = vmatpush3.bf16.msra.mxu0 %v5252_v5  ;;  %5279 = vmatprep.subr.bf16.mxu1 %v7848_v62  ;;  %v5260_v45 = vpack.c.bf16 %v7882_v56, %v7881_v7  ;;  %v7883_v62 = vand.u32 4294901760, %v7853_v6 }
 0x1b6   :  { %5255 = vmatprep.subr.bf16.mxu0 %v5254_v26 }
 0x1b7   :  { %v5262_v9 = vpack.c.bf16 %v7884_v21, %v7883_v62 }
 0x1b8   :  { %5281 = vmatpush3.bf16.msra.mxu1 %v6918_v2  ;;  %v7885_v2 = vand.u32 4294901760, %v7072_v38  ;;  %v7890_v38 = vand.u32 4294901760, %v7144_v15 }
 0x1b9   :  { %5257 = vmatpush3.bf16.msra.mxu0 %v5256_v13  ;;  %5283 = vmatprep.subr.bf16.mxu1 %v6929_v39  ;;  %v7886_v39 = vand.u32 4294901760, %v7089_v29 }
 0x1ba   :  { %5259 = vmatprep.subr.bf16.mxu0 %v5258_v55 }
 0x1bb   :  { %v5264_v57 = vpack.c.bf16 %v7886_v39, %v7885_v2 }
 0x1bc   :  { %5285 = vmatpush3.bf16.msra.mxu1 %v7855_v40  ;;  %v7889_v40 = vand.u32 4294901760, %v7115_v50 }
 0x1bd   :  { %5261 = vmatpush3.bf16.msra.mxu0 %v5260_v45  ;;  %5287 = vmatprep.subr.bf16.mxu1 %v7856_v18  ;;  %v7891_v18 = vand.u32 4294901760, %v7153_v31 }
 0x1be   :  { %5263 = vmatprep.subr.bf16.mxu0 %v5262_v9  ;;  %v5268_v29 = vpack.c.bf16 %v7890_v38, %v7889_v40 }
 0x1bf   :  { %v4010_v6 = vpop.f32.mrb[8].mxu0  ;;  %v5270_v37 = vpack.c.bf16 %v7892_v33, %v7891_v18 }
 0x1c0   :  { %v4011_v47 = vpop.f32.mrb[9].mxu0  ;;  %5289 = vmatpush3.bf16.msra.mxu1 %v7859_v54  ;;  %v7893_v54 = vand.u32 4294901760, %v7177_v24 }
 0x1c1   :  { %v4012_v22 = vadd.f32 %v4011_v47, %v4010_v6  ;;  %5265 = vmatpush3.bf16.msra.mxu0 %v5264_v57  ;;  %5291 = vmatprep.subr.bf16.mxu1 %v7860_v3  ;;  %v7894_v3 = vand.u32 4294901760, %v7180_v63 }
 0x1c2   :  { %5267 = vmatprep.subr.bf16.mxu0 %v5266_v12 }
 0x1c3   :  { %v1540_v10 = vadd.f32 %v4012_v22, %v1402_v30  ;;  %v5272_v50 = vpack.c.bf16 %v7894_v3, %v7893_v54 }
 0x1c4   :  { %5293 = vmatpush3.bf16.msra.mxu1 %v7861_v61 }
 0x1c5   :  { %5269 = vmatpush3.bf16.msra.mxu0 %v5268_v29  ;;  %5295 = vmatprep.subr.bf16.mxu1 %v7055_v28 }
 0x1c6   :  { %v4045_v48 = vpop.f32.mrb[8].mxu1  ;;  %5271 = vmatprep.subr.bf16.mxu0 %v5270_v37  ;;  %v3647_v37 = vld [vmem:[#allocation5] sm:$0xf] }
 0x1c7   :  { %v4046_v15 = vpop.f32.mrb[9].mxu1 }
 0x1c8   :  { %v4047_v35 = vadd.f32 %v4046_v15, %v4045_v48  ;;  %5297 = vmatpush3.bf16.msra.mxu1 %v7087_v25 }
 0x1c9   :  { %5273 = vmatpush3.bf16.msra.mxu0 %v5272_v50  ;;  %5299 = vmatprep.subr.bf16.mxu1 %v7195_v44 }
 0x1ca   :  { %v1648_v31 = vadd.f32 %v4047_v35, %v1540_v10 }
 0x1cc   :  { %3538 = vmatmul.mubr.f32.vlgmr.msra.gmra.mrb[22].mxu0 %v7139_v23  ;;  %5301 = vmatpush3.bf16.msra.mxu1 %v7199_v41 }
 0x1cd   :  { %5303 = vmatprep.subr.bf16.mxu1 %v7222_v17 }
 0x1d0   :  { %5305 = vmatpush3.bf16.msra.mxu1 %v7235_v52 }
 0x1d3   :  { %3642 = vmatmul.mubr.f32.vlgmr.msra.gmra.mrb[22].mxu1 %v7139_v23 }
 0x1df   :  { %v4080_v28 = vpop.f32.mrb[10].mxu0 }
 0x1e0   :  { %v4081_v42 = vpop.f32.mrb[11].mxu0 }
 0x1e1   :  { %v4082_v24 = vadd.f32 %v4081_v42, %v4080_v28  ;;  %v3697_v28 = vld [vmem:[%s7396_s3] ss:$0 sm:$0xff]  ;;  %s5386_s3 = scalar_lea.hbm %s7397_s4, 16 }
 0x1e2   :  { %p5387_p10 = scmp.ne.s32.totalorder %s7397_s4, %s5386_s3  ;;  %p5390_p11 = scmp.lt.u32.totalorder %s5386_s3, %s7397_s4 }
 0x1e3   :  { %v1816_v63 = vadd.f32 %v4082_v24, %v1648_v31 }
 0x1e4   :  { %p5392_p12 = pnand %p5390_p11, %p5387_p10 }
 0x1e6   :  { %v4115_v30 = vpop.f32.mrb[10].mxu1 }
 0x1e7   :  { %v4116_v25 = vpop.f32.mrb[11].mxu1 }
 0x1e8   :  { %v4117_v61 = vadd.f32 %v4116_v25, %v4115_v30 }
 0x1ea   :  { %v1920_v43 = vadd.f32 %v4117_v61, %v1816_v63 }
 0x1ff   :  { %v4150_v44 = vpop.f32.mrb[12].mxu0 }
 0x200   :  { %v4151_v14 = vpop.f32.mrb[13].mxu0 }
 0x201   :  { %v4152_v58 = vadd.f32 %v4151_v14, %v4150_v44 }
 0x203   :  { %v2032_v27 = vadd.f32 %v4152_v58, %v1920_v43 }
 0x206   :  { %v4185_v0 = vpop.f32.mrb[12].mxu1 }
 0x207   :  { %v4186_v41 = vpop.f32.mrb[13].mxu1 }
 0x208   :  { %v4187_v20 = vadd.f32 %v4186_v41, %v4185_v0 }
 0x20a   :  { %v2264_v17 = vadd.f32 %v4187_v20, %v2032_v27 }
 0x21f   :  { %v4220_v46 = vpop.f32.mrb[14].mxu0 }
 0x220   :  { %v4221_v52 = vpop.f32.mrb[15].mxu0 }
 0x221   :  { %v4222_v32 = vadd.f32 %v4221_v52, %v4220_v46 }
 0x223   :  { %v2402_v23 = vadd.f32 %v4222_v32, %v2264_v17 }
 0x226   :  { %v4255_v8 = vpop.f32.mrb[14].mxu1 }
 0x227   :  { %v4256_v16 = vpop.f32.mrb[15].mxu1 }
 0x228   :  { %v4257_v51 = vadd.f32 %v4256_v16, %v4255_v8 }
 0x22a   :  { %v2510_v11 = vadd.f32 %v4257_v51, %v2402_v23 }
 0x23f   :  { %v4290_v19 = vpop.f32.mrb[16].mxu0 }
 0x240   :  { %v4291_v5 = vpop.f32.mrb[17].mxu0 }
 0x241   :  { %v4292_v1 = vadd.f32 %v4291_v5, %v4290_v19 }
 0x243   :  { %v2678_v49 = vadd.f32 %v4292_v1, %v2510_v11 }
 0x246   :  { %v4325_v26 = vpop.f32.mrb[16].mxu1 }
 0x247   :  { %v4326_v34 = vpop.f32.mrb[17].mxu1 }
 0x248   :  { %v4327_v36 = vadd.f32 %v4326_v34, %v4325_v26 }
 0x24a   :  { %v2782_v13 = vadd.f32 %v4327_v36, %v2678_v49 }
 0x25f   :  { %v4360_v60 = vpop.f32.mrb[18].mxu0 }
 0x260   :  { %v4361_v53 = vpop.f32.mrb[19].mxu0 }
 0x261   :  { %v4362_v55 = vadd.f32 %v4361_v53, %v4360_v60 }
 0x263   :  { %v2894_v7 = vadd.f32 %v4362_v55, %v2782_v13 }
 0x266   :  { %v4395_v56 = vpop.f32.mrb[18].mxu1 }
 0x267   :  { %v4396_v45 = vpop.f32.mrb[19].mxu1 }
 0x268   :  { %v4397_v62 = vadd.f32 %v4396_v45, %v4395_v56 }
 0x26a   :  { %v3126_v21 = vadd.f32 %v4397_v62, %v2894_v7 }
 0x27f   :  { %v4430_v9 = vpop.f32.mrb[20].mxu0 }
 0x280   :  { %v4431_v2 = vpop.f32.mrb[21].mxu0 }
 0x281   :  { %v4432_v39 = vadd.f32 %v4431_v2, %v4430_v9 }
 0x283   :  { %v3264_v57 = vadd.f32 %v4432_v39, %v3126_v21 }
 0x286   :  { %v4465_v59 = vpop.f32.mrb[20].mxu1 }
 0x287   :  { %v4466_v4 = vpop.f32.mrb[21].mxu1 }
 0x288   :  { %v4467_v12 = vadd.f32 %v4466_v4, %v4465_v59 }
 0x28a   :  { %v3372_v6 = vadd.f32 %v4467_v12, %v3264_v57 }
 0x29f   :  { %v4500_v47 = vpop.f32.mrb[22].mxu0 }
 0x2a0   :  { %v4501_v22 = vpop.f32.mrb[23].mxu0 }
 0x2a1   :  { %v4502_v40 = vadd.f32 %v4501_v22, %v4500_v47 }
 0x2a3   :  { %v3540_v38 = vadd.f32 %v4502_v40, %v3372_v6 }
 0x2a6   :  { %v4535_v29 = vpop.f32.mrb[22].mxu1 }
 0x2a7   :  { %v4536_v18 = vpop.f32.mrb[23].mxu1 }
 0x2a8   :  { %v4537_v33 = vadd.f32 %v4536_v18, %v4535_v29 }
 0x2aa   :  { %v3644_v10 = vadd.f32 %v4537_v33, %v3540_v38 }
 0x2ac   :  { %v3648_v54 = vsub.f32 %v3644_v10, %v3647_v37 }
 0x2ae   :  { %v3649_v3 = vmul.f32 %v3648_v54, %v3648_v54 }
 0x2b0   :  { %v3651_v50 = vrot.slane %v3649_v3, 2 }
 0x2b2   :  { %v3653_v48 = vadd.f32 %v3651_v50, %v3649_v3 }
 0x2b4   :  { %5318 = vrsqrt.f32 %v3653_v48  ;;  %vm3656_vm0 = vcmp.eq.f32.partialorder %v3653_v48, inf  ;;  %v3659_v31 = vand.u32 2147483648, %v3653_v48  ;;  %vm3658_vm1 = vcmp.eq.f32.partialorder %v3653_v48, 0.0 }
 0x2be   :  { %v5319_v15 = vpop.eup %5318 }
 0x2bf   :  { %v3655_v35 = vmul.f32 %v5319_v15, %v3653_v48 }
 0x2c1   :  { %v3657_v42 = vsel %vm3656_vm0, %v3653_v48, %v3655_v35 }
 0x2c2   :  { %v3660_v24 = vsel %vm3658_vm1, %v3659_v31, %v3657_v42 }
 0x2c3   :  { %v3668_v63 = vmul.f32 %v3697_v28, %v3660_v24 }
 0x2c5   :  { %v3670_v30 = vsel %vm3669_vm2, %v3668_v63, 0.0 }
 0x2c6   :  { %3671 = vadd.xlane.f32.xlu0 %v3670_v30 }
 0x353   :  { %v3672_v25 = vpop.xlane.xlu0 %3671 }
 0x354   :  { %v3673_v61 = vrot.slane %v3672_v25, 4 }
 0x356   :  { %v3674_v43 = vadd.f32 %v3673_v61, %v3672_v25 }
 0x358   :  { %v3675_v44 = vrot.slane %v3674_v43, 2 }
 0x35a   :  { %v3676_v14 = vadd.f32 %v3675_v44, %v3674_v43 }
 0x35c   :  { %v3677_v58 = vrot.slane %v3676_v14, 1 }
 0x35e   :  { %v3678_v27 = vadd.f32 %v3677_v58, %v3676_v14 }
 0x360   :  { %5306 = vpush %v3678_v27 }
 0x391   :  { %s5307_s26 = spop %5306 }
 0x392   :  { %3681 = sst [smem:[#allocation8]] %s5307_s26 }
 0x393   :  { %5395 = shalt.err (!%p5392_p12)
}
 0x394   :  { %s5407_s7 = smov [#allocation8]  }
 0x395   :  { %3689 = dma.smem_to_hbm %s5407_s7, 16, %s7397_s4, [#allocation4]  }
 0x396   :  { %5400 = dma.done.wait [#allocation4], 16  }
 0x397   :  { %5401 = vsyncadd [#allocation4], 4294967280 }
 0x398   :  { %3693 = sfence }
 0x399   :  { %3694 = vsyncpa [#allocation3], 1 }
 0x39a   :  { %3695 = vsyncpa [#allocation6], 1 }
 0x39b   :  { %3696 = vsyncpa [#allocation4], 1 }

</bundles_post_ra>
